<compile_context>
chip_gen: v7x
topology: tpu7x:2x2x1
jax: 0.10.0
libtpu: 0.0.40
codegen_flags: <defaults>
</compile_context>

<pallas_src>
import functools

import jax
import jax.numpy as jnp
import numpy as np
from jax import lax
from jax.experimental import pallas as pl
from jax.experimental.pallas import tpu as pltpu


# ----------------------------------------------------------------------------
# Pallas kernel: one (bt, C) slab of whole batch elements, layout
# (batch*time, channels)  (time on sublanes, channels on lanes).
# ----------------------------------------------------------------------------
def _pg_kernel(num_layers, T, Fm, C,
               x_ref,                         # (bt, D)    compute dtype
               w_in_ref, b_in_ref,            # (D, F) cdt, (1, F) f32
               w_taps_ref, b_taps_ref,        # (L, F, 7F) cdt, (L, 1, 2F) f32
               w_comb_ref, b_comb_ref,        # (L, 2F, F) cdt, (L, 1, F) f32
               w_out_ref, b_out_ref,          # (F, C) cdt, (1, C) f32
               slab_ref):                     # (bt, S)  S = roundup(F+C, 128)
    bt = x_ref.shape[0]
    S = slab_ref.shape[1]
    cdt = w_in_ref.dtype            # matmul operand dtype (bf16 on TPU by default)

    # One hoisted iota; the (row % T) >= shift compare is done inline per use
    # (cheap VALU filler) instead of caching per-shift (bt, F) masks in VMEM.
    row_in_seq = lax.broadcasted_iota(jnp.int32, (bt, Fm), 0) % T

    def causal_shift(v, s):
        # shifted[t] = v[t - s] within each length-T sequence, zero otherwise.
        if s == 0:
            return v
        rolled = pltpu.roll(v, shift=s, axis=0)
        return jnp.where(row_in_seq >= s, rolled, 0.0)

    # conv_1x1_in
    f = (jnp.dot(x_ref[...], w_in_ref[...],
                 preferred_element_type=jnp.float32) + b_in_ref[...])

    for i in range(num_layers):
        d1 = 2 ** (num_layers - 1 - i)
        d2 = 2 ** i
        f_in = f

        # Six dilated-conv taps of BOTH branches plus the fused residual
        # column W_res = wf0+wf1 in ONE (bt,F)@(F,7F) MXU matmul.  Causal
        # time-shifts commute with the channel matmul, so roll+mask is
        # applied afterwards to the output slices (on the otherwise idle XLU).
        p = jnp.dot(f.astype(cdt), w_taps_ref[i],
                    preferred_element_type=jnp.float32)
        h1 = (causal_shift(p[:, 0 * Fm:1 * Fm], 2 * d1)
              + causal_shift(p[:, 1 * Fm:2 * Fm], d1)
              + p[:, 2 * Fm:3 * Fm])
        h2 = (causal_shift(p[:, 3 * Fm:4 * Fm], 2 * d2)
              + causal_shift(p[:, 4 * Fm:5 * Fm], d2)
              + p[:, 5 * Fm:6 * Fm])
        h = jnp.maximum(jnp.concatenate([h1, h2], axis=-1) + b_taps_ref[i], 0.0)

        # Fused 1x1 + conv_fusion:  f_pre = h @ [w11@wf0; w12@wf1]
        #                                   + f @ (wf0+wf1)  (= p[:, 6F:7F])
        #                                   + (b11@wf0 + b12@wf1 + bf)
        f_pre = (jnp.dot(h.astype(cdt), w_comb_ref[i],
                         preferred_element_type=jnp.float32)
                 + p[:, 6 * Fm:7 * Fm] + b_comb_ref[i])
        f = jnp.maximum(f_pre, 0.0) + f_in

    # Classifier + lane-dense packed writeback: [ f | logits | zero pad ].
    out = (jnp.dot(f.astype(cdt), w_out_ref[...],
                   preferred_element_type=jnp.float32) + b_out_ref[...])
    parts = [f, out]
    pad = S - Fm - C
    if pad:
        parts.append(jnp.zeros((bt, pad), jnp.float32))
    slab_ref[...] = jnp.concatenate(parts, axis=-1).astype(slab_ref.dtype)


def _default_compute_dtype():
    # bf16 matmul operands on every TPU generation (v5e MXU is bf16-native);
    # elementwise / accumulation stays f32 inside the kernel.
    try:
        if jax.devices()[0].platform == "tpu":
            return jnp.dtype(jnp.bfloat16)
    except Exception:
        pass
    return jnp.dtype(jnp.float32)


# ----------------------------------------------------------------------------
# Wrapper: PyTorch-convention (N, dim, T) input -> (f, out) as (N, F, T), (N, C, T).
# Weight fusion / concatenation is done here, OUTSIDE the pallas_call.
# ----------------------------------------------------------------------------
def prediction_generation(x_ndt, params, num_layers, *,
                          compute_dtype=None, batch_blocks=None,
                          out_dtype=jnp.float32):
    N, D, T = x_ndt.shape
    Fm = params["w_in"].shape[1]
    C = params["w_out"].shape[1]
    S = ((Fm + C + 127) // 128) * 128        # lane-dense packed output width

    cdt = (jnp.dtype(compute_dtype) if compute_dtype is not None
           else _default_compute_dtype())
    odt = jnp.dtype(out_dtype)

    # Parallel batch tiling: as many blocks as possible while keeping
    # bt = (N / batch_blocks) * T a multiple of 8 (the (8,128) constraint).
    if batch_blocks is None:
        batch_blocks = N
    batch_blocks = max(1, min(batch_blocks, N))
    while batch_blocks > 1 and (N % batch_blocks
                                or ((N // batch_blocks) * T) % 8):
        batch_blocks -= 1
    bt = (N // batch_blocks) * T

    # (N, D, T) -> (N*T, D): batch folded into the sublane axis.
    x = jnp.transpose(x_ndt, (0, 2, 1)).reshape(N * T, D).astype(cdt)

    # ---- fused weights (built once in the wrapper) ---------------------------
    wd1, wd2 = params["wd1"], params["wd2"]                  # (L, 3, F, F)
    wf0, wf1 = params["wf"][:, 0], params["wf"][:, 1]        # (L, F, F)
    w_res = wf0 + wf1                                        # residual path
    w_taps = jnp.concatenate([wd1[:, 0], wd1[:, 1], wd1[:, 2],
                              wd2[:, 0], wd2[:, 1], wd2[:, 2],
                              w_res], axis=-1)               # (L, F, 7F)
    b_taps = jnp.concatenate([params["bd1"], params["bd2"]], axis=-1)  # (L,1,2F)
    w_comb = jnp.concatenate(
        [jnp.einsum("lij,ljk->lik", params["w11"], wf0),
         jnp.einsum("lij,ljk->lik", params["w12"], wf1)], axis=-2)     # (L,2F,F)
    b_comb = (jnp.einsum("lij,ljk->lik", params["b11"], wf0)
              + jnp.einsum("lij,ljk->lik", params["b12"], wf1)
              + params["bf"])                                          # (L,1,F)

    w_in = params["w_in"].astype(cdt)
    w_taps = w_taps.astype(cdt)
    w_comb = w_comb.astype(cdt)
    w_out = params["w_out"].astype(cdt)

    inputs = (x, w_in, params["b_in"], w_taps, b_taps, w_comb, b_comb,
              w_out, params["b_out"])

    def _const_spec(a):
        nd = a.ndim
        return pl.BlockSpec(a.shape, lambda g, nd=nd: (0,) * nd)

    in_specs = [pl.BlockSpec((bt, D), lambda g: (g, 0))] \
        + [_const_spec(a) for a in inputs[1:]]
    out_specs = pl.BlockSpec((bt, S), lambda g: (g, 0))

    # ---- cost estimate + explicit VMEM budget --------------------------------
    flops = 2 * N * T * (D * Fm + num_layers * 9 * Fm * Fm + Fm * C)
    weight_bytes = sum(int(np.prod(a.shape)) * jnp.dtype(a.dtype).itemsize
                       for a in inputs[1:])
    bytes_accessed = (weight_bytes + N * T * D * cdt.itemsize
                      + N * T * S * odt.itemsize)
    cost = pl.CostEstimate(flops=int(flops), transcendentals=0,
                           bytes_accessed=int(bytes_accessed))

    act_bytes = bt * (9 * Fm + 2 * Fm + S) * 4              # live f32 intermediates
    io_bytes = 2 * bt * (D * cdt.itemsize + S * odt.itemsize)  # double-buffered tiles
    est = 2 * weight_bytes + 2 * act_bytes + io_bytes
    try:
        cap = int(0.85 * pltpu.get_tpu_info().vmem_capacity_bytes)
    except Exception:
        cap = 96 << 20
    vmem_limit = int(max(32 << 20, min(est, cap)))

    slab = pl.pallas_call(
        functools.partial(_pg_kernel, num_layers, T, Fm, C),
        out_shape=jax.ShapeDtypeStruct((N * T, S), odt),
        grid=(batch_blocks,),
        in_specs=in_specs,
        out_specs=out_specs,
        compiler_params=pltpu.CompilerParams(
            dimension_semantics=("parallel",),
            vmem_limit_bytes=vmem_limit),
        cost_estimate=cost,
    )(*inputs)

    f_flat = slab[:, :Fm]
    out_flat = slab[:, Fm:Fm + C]
    f_out = jnp.transpose(f_flat.reshape(N, T, Fm), (0, 2, 1))
    out = jnp.transpose(out_flat.reshape(N, T, C), (0, 2, 1))
    return f_out, out


# ----------------------------------------------------------------------------
# Pure-JAX reference (original, unfused weights; eval-mode dropout == identity).
# ----------------------------------------------------------------------------
def _ref_forward_single(x_td, params, num_layers):
    def causal_shift(v, s):
        if s == 0:
            return v
        return jnp.concatenate([jnp.zeros((s, v.shape[1]), v.dtype), v[:-s]], axis=0)

    def dilated_residual(f, wd, bd, w1, b1, d):
        h = (causal_shift(f, 2 * d) @ wd[0] + causal_shift(f, d) @ wd[1]
             + f @ wd[2] + bd)
        h = jnp.maximum(h, 0.0)
        h = h @ w1 + b1
        return f + h

    f = x_td @ params["w_in"] + params["b_in"]
    for i in range(num_layers):
        d1 = 2 ** (num_layers - 1 - i)
        d2 = 2 ** i
        f_in = f
        o1 = dilated_residual(f, params["wd1"][i], params["bd1"][i],
                              params["w11"][i], params["b11"][i], d1)
        o2 = dilated_residual(f, params["wd2"][i], params["bd2"][i],
                              params["w12"][i], params["b12"][i], d2)
        f = o1 @ params["wf"][i, 0] + o2 @ params["wf"][i, 1] + params["bf"][i]
        f = jnp.maximum(f, 0.0)
        f = f + f_in
    out = f @ params["w_out"] + params["b_out"]
    return f, out


# ----------------------------------------------------------------------------
# Deterministic parameter construction (Conv1d weights stored as (in, out)).
# ----------------------------------------------------------------------------
def make_params(key, num_layers, num_f_maps, dim, num_classes):
    L, F, D, C = num_layers, num_f_maps, dim, num_classes
    keys = jax.random.split(key, 16)
    s = 0.1
    n = lambda k, shape: (s * jax.random.normal(k, shape)).astype(jnp.float32)
    return {
        "w_in": n(keys[0], (D, F)), "b_in": n(keys[1], (1, F)),
        "wd1": n(keys[2], (L, 3, F, F)), "bd1": n(keys[3], (L, 1, F)),
        "w11": n(keys[4], (L, F, F)),    "b11": n(keys[5], (L, 1, F)),
        "wd2": n(keys[6], (L, 3, F, F)), "bd2": n(keys[7], (L, 1, F)),
        "w12": n(keys[8], (L, F, F)),    "b12": n(keys[9], (L, 1, F)),
        "wf":  n(keys[10], (L, 2, F, F)), "bf": n(keys[11], (L, 1, F)),
        "w_out": n(keys[12], (F, C)), "b_out": n(keys[13], (1, C)),
    }


if __name__ == "__main__":
    # small shapes consistent with the module's forward
    N, D, T = 2, 16, 64          # batch, input feature dim, sequence length
    num_layers, F, C = 3, 32, 8  # layers, num_f_maps, num_classes

    key = jax.random.PRNGKey(0)
    kx, kp = jax.random.split(key)
    x = jax.random.normal(kx, (N, D, T), dtype=jnp.float32)   # PyTorch-style (N, dim, T)
    params = make_params(kp, num_layers, F, D, C)

    # pure-JAX reference
    f_r, out_r = jax.vmap(lambda xt: _ref_forward_single(xt, params, num_layers))(
        jnp.transpose(x, (0, 2, 1)))
    f_r = jnp.transpose(f_r, (0, 2, 1))
    out_r = jnp.transpose(out_r, (0, 2, 1))

    # f32 matmul path — tight tolerance
    f_k, out_k = prediction_generation(x, params, num_layers, compute_dtype=jnp.float32)
    jax.block_until_ready((f_k, out_k))
    np.testing.assert_allclose(np.asarray(f_k), np.asarray(f_r), atol=2e-4, rtol=2e-4)
    np.testing.assert_allclose(np.asarray(out_k), np.asarray(out_r), atol=2e-4, rtol=2e-4)

    # bf16 matmul path (default on TPU) — bf16 operands, f32 accumulation
    f_b, out_b = prediction_generation(x, params, num_layers, compute_dtype=jnp.bfloat16)
    jax.block_until_ready((f_b, out_b))
    np.testing.assert_allclose(np.asarray(f_b), np.asarray(f_r), atol=5e-2, rtol=5e-2)
    np.testing.assert_allclose(np.asarray(out_b), np.asarray(out_r), atol=5e-2, rtol=5e-2)

    # default path (exercises device-dependent compute dtype selection)
    f_d, out_d = prediction_generation(x, params, num_layers)
    jax.block_until_ready((f_d, out_d))
    np.testing.assert_allclose(np.asarray(out_d), np.asarray(out_r), atol=5e-2, rtol=5e-2)

    # TODO(synk): nn.Dropout is active only in training mode; inference (identity) is implemented.
    print("KERNEL_OK")
</pallas_src>

<mosaic_0001>
module attributes {stable_mosaic.version = 11 : i64} {
  func.func @_pg_kernel(%arg0: i32, %arg1: memref<64x16xf32, #tpu.memory_space<vmem>>, %arg2: memref<16x32xf32, #tpu.memory_space<vmem>>, %arg3: memref<1x32xf32, #tpu.memory_space<vmem>>, %arg4: memref<3x32x224xf32, #tpu.memory_space<vmem>>, %arg5: memref<3x1x64xf32, #tpu.memory_space<vmem>>, %arg6: memref<3x64x32xf32, #tpu.memory_space<vmem>>, %arg7: memref<3x1x32xf32, #tpu.memory_space<vmem>>, %arg8: memref<32x8xf32, #tpu.memory_space<vmem>>, %arg9: memref<1x8xf32, #tpu.memory_space<vmem>>, %arg10: memref<64x128xf32, #tpu.memory_space<vmem>>) attributes {dimension_semantics = [#tpu.dimension_semantics<parallel>], iteration_bounds = array<i64: 2>, scalar_prefetch = 0 : i64, scratch_operands = 0 : i64, tpu.core_type = #tpu.core_type<tc>, window_params = [{transform_indices = @transform_0, window_bounds = array<i64: 64, 16>}, {pipeline_mode = #tpu.pipeline_mode<synchronous>, transform_indices = @transform_1, window_bounds = array<i64: 16, 32>}, {pipeline_mode = #tpu.pipeline_mode<synchronous>, transform_indices = @transform_2, window_bounds = array<i64: 1, 32>}, {pipeline_mode = #tpu.pipeline_mode<synchronous>, transform_indices = @transform_3, window_bounds = array<i64: 3, 32, 224>}, {pipeline_mode = #tpu.pipeline_mode<synchronous>, transform_indices = @transform_4, window_bounds = array<i64: 3, 1, 64>}, {pipeline_mode = #tpu.pipeline_mode<synchronous>, transform_indices = @transform_5, window_bounds = array<i64: 3, 64, 32>}, {pipeline_mode = #tpu.pipeline_mode<synchronous>, transform_indices = @transform_6, window_bounds = array<i64: 3, 1, 32>}, {pipeline_mode = #tpu.pipeline_mode<synchronous>, transform_indices = @transform_7, window_bounds = array<i64: 32, 8>}, {pipeline_mode = #tpu.pipeline_mode<synchronous>, transform_indices = @transform_8, window_bounds = array<i64: 1, 8>}, {transform_indices = @transform_9, window_bounds = array<i64: 64, 128>}]} {
    %0 = tpu.iota {dimensions = array<i32: 0>} : vector<64x32xi32>
    %c64_i32 = arith.constant 64 : i32
    %c0_i32 = arith.constant 0 : i32
    %1 = arith.cmpi eq, %c64_i32, %c0_i32 : i32
    %c1_i32 = arith.constant 1 : i32
    %2 = arith.select %1, %c1_i32, %c64_i32 : i32
    %3 = vector.broadcast %2 : i32 to vector<64x32xi32>
    %4 = arith.remsi %0, %3 : vector<64x32xi32>
    %c0_i32_0 = arith.constant 0 : i32
    %5 = vector.broadcast %c0_i32_0 : i32 to vector<64x32xi32>
    %6 = arith.cmpi ne, %4, %5 : vector<64x32xi32>
    %c0_i32_1 = arith.constant 0 : i32
    %7 = vector.broadcast %c0_i32_1 : i32 to vector<64x32xi32>
    %8 = arith.cmpi slt, %4, %7 : vector<64x32xi32>
    %c0_i32_2 = arith.constant 0 : i32
    %9 = arith.cmpi slt, %2, %c0_i32_2 : i32
    %10 = vector.broadcast %9 : i1 to vector<64x32xi1>
    %11 = vector.broadcast %10 : vector<64x32xi1> to vector<64x32xi1>
    %12 = arith.xori %8, %11 : vector<64x32xi1>
    %13 = arith.andi %12, %6 : vector<64x32xi1>
    %14 = vector.broadcast %2 : i32 to vector<64x32xi32>
    %15 = arith.addi %4, %14 : vector<64x32xi32>
    %16 = arith.select %13, %15, %4 : vector<64x32xi1>, vector<64x32xi32>
    %c0 = arith.constant 0 : index
    %c0_3 = arith.constant 0 : index
    %17 = vector.load %arg1[%c0, %c0_3] : memref<64x16xf32, #tpu.memory_space<vmem>>, vector<64x16xf32>
    %c0_4 = arith.constant 0 : index
    %c0_5 = arith.constant 0 : index
    %18 = vector.load %arg2[%c0_4, %c0_5] : memref<16x32xf32, #tpu.memory_space<vmem>>, vector<16x32xf32>
    %cst = arith.constant dense<0.000000e+00> : vector<64x32xf32>
    %19 = tpu.matmul %17, %18, %cst {dimension_numbers = #tpu.dot_dimension_numbers<[1], [0], [0], [1], [0, 0, 1, 1], [], []>} : vector<64x16xf32>, vector<16x32xf32>, vector<64x32xf32> -> vector<64x32xf32>
    %c0_6 = arith.constant 0 : index
    %c0_7 = arith.constant 0 : index
    %20 = vector.load %arg3[%c0_6, %c0_7] : memref<1x32xf32, #tpu.memory_space<vmem>>, vector<1x32xf32>
    %21 = vector.broadcast %20 : vector<1x32xf32> to vector<64x32xf32>
    %22 = arith.addf %19, %21 : vector<64x32xf32>
    %c0_8 = arith.constant 0 : index
    %c0_9 = arith.constant 0 : index
    %c0_10 = arith.constant 0 : index
    %23 = vector.load %arg4[%c0_8, %c0_9, %c0_10] : memref<3x32x224xf32, #tpu.memory_space<vmem>>, vector<1x32x224xf32>
    %24 = vector.shape_cast %23 : vector<1x32x224xf32> to vector<32x224xf32>
    %cst_11 = arith.constant dense<0.000000e+00> : vector<64x224xf32>
    %25 = tpu.matmul %22, %24, %cst_11 {dimension_numbers = #tpu.dot_dimension_numbers<[1], [0], [0], [1], [0, 0, 1, 1], [], []>} : vector<64x32xf32>, vector<32x224xf32>, vector<64x224xf32> -> vector<64x224xf32>
    %26 = vector.extract_strided_slice %25 {offsets = [0, 0], sizes = [64, 32], strides = [1, 1]} : vector<64x224xf32> to vector<64x32xf32>
    %c8_i32 = arith.constant 8 : i32
    %27 = tpu.dynamic_rotate %26 by %c8_i32 dim 0 : vector<64x32xf32>, i32 -> vector<64x32xf32>
    %c8_i32_12 = arith.constant 8 : i32
    %28 = vector.broadcast %c8_i32_12 : i32 to vector<64x32xi32>
    %29 = arith.cmpi sge, %16, %28 : vector<64x32xi32>
    %cst_13 = arith.constant 0.000000e+00 : f32
    %30 = vector.broadcast %cst_13 : f32 to vector<64x32xf32>
    %31 = arith.select %29, %27, %30 : vector<64x32xi1>, vector<64x32xf32>
    %32 = vector.extract_strided_slice %25 {offsets = [0, 32], sizes = [64, 32], strides = [1, 1]} : vector<64x224xf32> to vector<64x32xf32>
    %c4_i32 = arith.constant 4 : i32
    %33 = tpu.dynamic_rotate %32 by %c4_i32 dim 0 : vector<64x32xf32>, i32 -> vector<64x32xf32>
    %c4_i32_14 = arith.constant 4 : i32
    %34 = vector.broadcast %c4_i32_14 : i32 to vector<64x32xi32>
    %35 = arith.cmpi sge, %16, %34 : vector<64x32xi32>
    %cst_15 = arith.constant 0.000000e+00 : f32
    %36 = vector.broadcast %cst_15 : f32 to vector<64x32xf32>
    %37 = arith.select %35, %33, %36 : vector<64x32xi1>, vector<64x32xf32>
    %38 = arith.addf %31, %37 : vector<64x32xf32>
    %39 = vector.extract_strided_slice %25 {offsets = [0, 64], sizes = [64, 32], strides = [1, 1]} : vector<64x224xf32> to vector<64x32xf32>
    %40 = arith.addf %38, %39 : vector<64x32xf32>
    %41 = vector.extract_strided_slice %25 {offsets = [0, 96], sizes = [64, 32], strides = [1, 1]} : vector<64x224xf32> to vector<64x32xf32>
    %c2_i32 = arith.constant 2 : i32
    %42 = tpu.dynamic_rotate %41 by %c2_i32 dim 0 : vector<64x32xf32>, i32 -> vector<64x32xf32>
    %c2_i32_16 = arith.constant 2 : i32
    %43 = vector.broadcast %c2_i32_16 : i32 to vector<64x32xi32>
    %44 = arith.cmpi sge, %16, %43 : vector<64x32xi32>
    %cst_17 = arith.constant 0.000000e+00 : f32
    %45 = vector.broadcast %cst_17 : f32 to vector<64x32xf32>
    %46 = arith.select %44, %42, %45 : vector<64x32xi1>, vector<64x32xf32>
    %47 = vector.extract_strided_slice %25 {offsets = [0, 128], sizes = [64, 32], strides = [1, 1]} : vector<64x224xf32> to vector<64x32xf32>
    %c1_i32_18 = arith.constant 1 : i32
    %48 = tpu.dynamic_rotate %47 by %c1_i32_18 dim 0 : vector<64x32xf32>, i32 -> vector<64x32xf32>
    %c1_i32_19 = arith.constant 1 : i32
    %49 = vector.broadcast %c1_i32_19 : i32 to vector<64x32xi32>
    %50 = arith.cmpi sge, %16, %49 : vector<64x32xi32>
    %cst_20 = arith.constant 0.000000e+00 : f32
    %51 = vector.broadcast %cst_20 : f32 to vector<64x32xf32>
    %52 = arith.select %50, %48, %51 : vector<64x32xi1>, vector<64x32xf32>
    %53 = arith.addf %46, %52 : vector<64x32xf32>
    %54 = vector.extract_strided_slice %25 {offsets = [0, 160], sizes = [64, 32], strides = [1, 1]} : vector<64x224xf32> to vector<64x32xf32>
    %55 = arith.addf %53, %54 : vector<64x32xf32>
    %56 = tpu.concatenate %40, %55 in 1 : vector<64x32xf32>, vector<64x32xf32> -> vector<64x64xf32>
    %c0_21 = arith.constant 0 : index
    %c0_22 = arith.constant 0 : index
    %c0_23 = arith.constant 0 : index
    %57 = vector.load %arg5[%c0_21, %c0_22, %c0_23] : memref<3x1x64xf32, #tpu.memory_space<vmem>>, vector<1x1x64xf32>
    %58 = vector.shape_cast %57 : vector<1x1x64xf32> to vector<1x64xf32>
    %59 = vector.broadcast %58 : vector<1x64xf32> to vector<64x64xf32>
    %60 = arith.addf %56, %59 : vector<64x64xf32>
    %cst_24 = arith.constant 0.000000e+00 : f32
    %61 = vector.broadcast %cst_24 : f32 to vector<64x64xf32>
    %62 = arith.maximumf %60, %61 : vector<64x64xf32>
    %c0_25 = arith.constant 0 : index
    %c0_26 = arith.constant 0 : index
    %c0_27 = arith.constant 0 : index
    %63 = vector.load %arg6[%c0_25, %c0_26, %c0_27] : memref<3x64x32xf32, #tpu.memory_space<vmem>>, vector<1x64x32xf32>
    %64 = vector.shape_cast %63 : vector<1x64x32xf32> to vector<64x32xf32>
    %cst_28 = arith.constant dense<0.000000e+00> : vector<64x32xf32>
    %65 = tpu.matmul %62, %64, %cst_28 {dimension_numbers = #tpu.dot_dimension_numbers<[1], [0], [0], [1], [0, 0, 1, 1], [], []>} : vector<64x64xf32>, vector<64x32xf32>, vector<64x32xf32> -> vector<64x32xf32>
    %66 = vector.extract_strided_slice %25 {offsets = [0, 192], sizes = [64, 32], strides = [1, 1]} : vector<64x224xf32> to vector<64x32xf32>
    %67 = arith.addf %65, %66 : vector<64x32xf32>
    %c0_29 = arith.constant 0 : index
    %c0_30 = arith.constant 0 : index
    %c0_31 = arith.constant 0 : index
    %68 = vector.load %arg7[%c0_29, %c0_30, %c0_31] : memref<3x1x32xf32, #tpu.memory_space<vmem>>, vector<1x1x32xf32>
    %69 = vector.shape_cast %68 : vector<1x1x32xf32> to vector<1x32xf32>
    %70 = vector.broadcast %69 : vector<1x32xf32> to vector<64x32xf32>
    %71 = arith.addf %67, %70 : vector<64x32xf32>
    %cst_32 = arith.constant 0.000000e+00 : f32
    %72 = vector.broadcast %cst_32 : f32 to vector<64x32xf32>
    %73 = arith.maximumf %71, %72 : vector<64x32xf32>
    %74 = arith.addf %73, %22 : vector<64x32xf32>
    %c1 = arith.constant 1 : index
    %c0_33 = arith.constant 0 : index
    %c0_34 = arith.constant 0 : index
    %75 = vector.load %arg4[%c1, %c0_33, %c0_34] : memref<3x32x224xf32, #tpu.memory_space<vmem>>, vector<1x32x224xf32>
    %76 = vector.shape_cast %75 : vector<1x32x224xf32> to vector<32x224xf32>
    %cst_35 = arith.constant dense<0.000000e+00> : vector<64x224xf32>
    %77 = tpu.matmul %74, %76, %cst_35 {dimension_numbers = #tpu.dot_dimension_numbers<[1], [0], [0], [1], [0, 0, 1, 1], [], []>} : vector<64x32xf32>, vector<32x224xf32>, vector<64x224xf32> -> vector<64x224xf32>
    %78 = vector.extract_strided_slice %77 {offsets = [0, 0], sizes = [64, 32], strides = [1, 1]} : vector<64x224xf32> to vector<64x32xf32>
    %c4_i32_36 = arith.constant 4 : i32
    %79 = tpu.dynamic_rotate %78 by %c4_i32_36 dim 0 : vector<64x32xf32>, i32 -> vector<64x32xf32>
    %c4_i32_37 = arith.constant 4 : i32
    %80 = vector.broadcast %c4_i32_37 : i32 to vector<64x32xi32>
    %81 = arith.cmpi sge, %16, %80 : vector<64x32xi32>
    %cst_38 = arith.constant 0.000000e+00 : f32
    %82 = vector.broadcast %cst_38 : f32 to vector<64x32xf32>
    %83 = arith.select %81, %79, %82 : vector<64x32xi1>, vector<64x32xf32>
    %84 = vector.extract_strided_slice %77 {offsets = [0, 32], sizes = [64, 32], strides = [1, 1]} : vector<64x224xf32> to vector<64x32xf32>
    %c2_i32_39 = arith.constant 2 : i32
    %85 = tpu.dynamic_rotate %84 by %c2_i32_39 dim 0 : vector<64x32xf32>, i32 -> vector<64x32xf32>
    %c2_i32_40 = arith.constant 2 : i32
    %86 = vector.broadcast %c2_i32_40 : i32 to vector<64x32xi32>
    %87 = arith.cmpi sge, %16, %86 : vector<64x32xi32>
    %cst_41 = arith.constant 0.000000e+00 : f32
    %88 = vector.broadcast %cst_41 : f32 to vector<64x32xf32>
    %89 = arith.select %87, %85, %88 : vector<64x32xi1>, vector<64x32xf32>
    %90 = arith.addf %83, %89 : vector<64x32xf32>
    %91 = vector.extract_strided_slice %77 {offsets = [0, 64], sizes = [64, 32], strides = [1, 1]} : vector<64x224xf32> to vector<64x32xf32>
    %92 = arith.addf %90, %91 : vector<64x32xf32>
    %93 = vector.extract_strided_slice %77 {offsets = [0, 96], sizes = [64, 32], strides = [1, 1]} : vector<64x224xf32> to vector<64x32xf32>
    %c4_i32_42 = arith.constant 4 : i32
    %94 = tpu.dynamic_rotate %93 by %c4_i32_42 dim 0 : vector<64x32xf32>, i32 -> vector<64x32xf32>
    %c4_i32_43 = arith.constant 4 : i32
    %95 = vector.broadcast %c4_i32_43 : i32 to vector<64x32xi32>
    %96 = arith.cmpi sge, %16, %95 : vector<64x32xi32>
    %cst_44 = arith.constant 0.000000e+00 : f32
    %97 = vector.broadcast %cst_44 : f32 to vector<64x32xf32>
    %98 = arith.select %96, %94, %97 : vector<64x32xi1>, vector<64x32xf32>
    %99 = vector.extract_strided_slice %77 {offsets = [0, 128], sizes = [64, 32], strides = [1, 1]} : vector<64x224xf32> to vector<64x32xf32>
    %c2_i32_45 = arith.constant 2 : i32
    %100 = tpu.dynamic_rotate %99 by %c2_i32_45 dim 0 : vector<64x32xf32>, i32 -> vector<64x32xf32>
    %c2_i32_46 = arith.constant 2 : i32
    %101 = vector.broadcast %c2_i32_46 : i32 to vector<64x32xi32>
    %102 = arith.cmpi sge, %16, %101 : vector<64x32xi32>
    %cst_47 = arith.constant 0.000000e+00 : f32
    %103 = vector.broadcast %cst_47 : f32 to vector<64x32xf32>
    %104 = arith.select %102, %100, %103 : vector<64x32xi1>, vector<64x32xf32>
    %105 = arith.addf %98, %104 : vector<64x32xf32>
    %106 = vector.extract_strided_slice %77 {offsets = [0, 160], sizes = [64, 32], strides = [1, 1]} : vector<64x224xf32> to vector<64x32xf32>
    %107 = arith.addf %105, %106 : vector<64x32xf32>
    %108 = tpu.concatenate %92, %107 in 1 : vector<64x32xf32>, vector<64x32xf32> -> vector<64x64xf32>
    %c1_48 = arith.constant 1 : index
    %c0_49 = arith.constant 0 : index
    %c0_50 = arith.constant 0 : index
    %109 = vector.load %arg5[%c1_48, %c0_49, %c0_50] : memref<3x1x64xf32, #tpu.memory_space<vmem>>, vector<1x1x64xf32>
    %110 = vector.shape_cast %109 : vector<1x1x64xf32> to vector<1x64xf32>
    %111 = vector.broadcast %110 : vector<1x64xf32> to vector<64x64xf32>
    %112 = arith.addf %108, %111 : vector<64x64xf32>
    %cst_51 = arith.constant 0.000000e+00 : f32
    %113 = vector.broadcast %cst_51 : f32 to vector<64x64xf32>
    %114 = arith.maximumf %112, %113 : vector<64x64xf32>
    %c1_52 = arith.constant 1 : index
    %c0_53 = arith.constant 0 : index
    %c0_54 = arith.constant 0 : index
    %115 = vector.load %arg6[%c1_52, %c0_53, %c0_54] : memref<3x64x32xf32, #tpu.memory_space<vmem>>, vector<1x64x32xf32>
    %116 = vector.shape_cast %115 : vector<1x64x32xf32> to vector<64x32xf32>
    %cst_55 = arith.constant dense<0.000000e+00> : vector<64x32xf32>
    %117 = tpu.matmul %114, %116, %cst_55 {dimension_numbers = #tpu.dot_dimension_numbers<[1], [0], [0], [1], [0, 0, 1, 1], [], []>} : vector<64x64xf32>, vector<64x32xf32>, vector<64x32xf32> -> vector<64x32xf32>
    %118 = vector.extract_strided_slice %77 {offsets = [0, 192], sizes = [64, 32], strides = [1, 1]} : vector<64x224xf32> to vector<64x32xf32>
    %119 = arith.addf %117, %118 : vector<64x32xf32>
    %c1_56 = arith.constant 1 : index
    %c0_57 = arith.constant 0 : index
    %c0_58 = arith.constant 0 : index
    %120 = vector.load %arg7[%c1_56, %c0_57, %c0_58] : memref<3x1x32xf32, #tpu.memory_space<vmem>>, vector<1x1x32xf32>
    %121 = vector.shape_cast %120 : vector<1x1x32xf32> to vector<1x32xf32>
    %122 = vector.broadcast %121 : vector<1x32xf32> to vector<64x32xf32>
    %123 = arith.addf %119, %122 : vector<64x32xf32>
    %cst_59 = arith.constant 0.000000e+00 : f32
    %124 = vector.broadcast %cst_59 : f32 to vector<64x32xf32>
    %125 = arith.maximumf %123, %124 : vector<64x32xf32>
    %126 = arith.addf %125, %74 : vector<64x32xf32>
    %c2 = arith.constant 2 : index
    %c0_60 = arith.constant 0 : index
    %c0_61 = arith.constant 0 : index
    %127 = vector.load %arg4[%c2, %c0_60, %c0_61] : memref<3x32x224xf32, #tpu.memory_space<vmem>>, vector<1x32x224xf32>
    %128 = vector.shape_cast %127 : vector<1x32x224xf32> to vector<32x224xf32>
    %cst_62 = arith.constant dense<0.000000e+00> : vector<64x224xf32>
    %129 = tpu.matmul %126, %128, %cst_62 {dimension_numbers = #tpu.dot_dimension_numbers<[1], [0], [0], [1], [0, 0, 1, 1], [], []>} : vector<64x32xf32>, vector<32x224xf32>, vector<64x224xf32> -> vector<64x224xf32>
    %130 = vector.extract_strided_slice %129 {offsets = [0, 0], sizes = [64, 32], strides = [1, 1]} : vector<64x224xf32> to vector<64x32xf32>
    %c2_i32_63 = arith.constant 2 : i32
    %131 = tpu.dynamic_rotate %130 by %c2_i32_63 dim 0 : vector<64x32xf32>, i32 -> vector<64x32xf32>
    %c2_i32_64 = arith.constant 2 : i32
    %132 = vector.broadcast %c2_i32_64 : i32 to vector<64x32xi32>
    %133 = arith.cmpi sge, %16, %132 : vector<64x32xi32>
    %cst_65 = arith.constant 0.000000e+00 : f32
    %134 = vector.broadcast %cst_65 : f32 to vector<64x32xf32>
    %135 = arith.select %133, %131, %134 : vector<64x32xi1>, vector<64x32xf32>
    %136 = vector.extract_strided_slice %129 {offsets = [0, 32], sizes = [64, 32], strides = [1, 1]} : vector<64x224xf32> to vector<64x32xf32>
    %c1_i32_66 = arith.constant 1 : i32
    %137 = tpu.dynamic_rotate %136 by %c1_i32_66 dim 0 : vector<64x32xf32>, i32 -> vector<64x32xf32>
    %c1_i32_67 = arith.constant 1 : i32
    %138 = vector.broadcast %c1_i32_67 : i32 to vector<64x32xi32>
    %139 = arith.cmpi sge, %16, %138 : vector<64x32xi32>
    %cst_68 = arith.constant 0.000000e+00 : f32
    %140 = vector.broadcast %cst_68 : f32 to vector<64x32xf32>
    %141 = arith.select %139, %137, %140 : vector<64x32xi1>, vector<64x32xf32>
    %142 = arith.addf %135, %141 : vector<64x32xf32>
    %143 = vector.extract_strided_slice %129 {offsets = [0, 64], sizes = [64, 32], strides = [1, 1]} : vector<64x224xf32> to vector<64x32xf32>
    %144 = arith.addf %142, %143 : vector<64x32xf32>
    %145 = vector.extract_strided_slice %129 {offsets = [0, 96], sizes = [64, 32], strides = [1, 1]} : vector<64x224xf32> to vector<64x32xf32>
    %c8_i32_69 = arith.constant 8 : i32
    %146 = tpu.dynamic_rotate %145 by %c8_i32_69 dim 0 : vector<64x32xf32>, i32 -> vector<64x32xf32>
    %c8_i32_70 = arith.constant 8 : i32
    %147 = vector.broadcast %c8_i32_70 : i32 to vector<64x32xi32>
    %148 = arith.cmpi sge, %16, %147 : vector<64x32xi32>
    %cst_71 = arith.constant 0.000000e+00 : f32
    %149 = vector.broadcast %cst_71 : f32 to vector<64x32xf32>
    %150 = arith.select %148, %146, %149 : vector<64x32xi1>, vector<64x32xf32>
    %151 = vector.extract_strided_slice %129 {offsets = [0, 128], sizes = [64, 32], strides = [1, 1]} : vector<64x224xf32> to vector<64x32xf32>
    %c4_i32_72 = arith.constant 4 : i32
    %152 = tpu.dynamic_rotate %151 by %c4_i32_72 dim 0 : vector<64x32xf32>, i32 -> vector<64x32xf32>
    %c4_i32_73 = arith.constant 4 : i32
    %153 = vector.broadcast %c4_i32_73 : i32 to vector<64x32xi32>
    %154 = arith.cmpi sge, %16, %153 : vector<64x32xi32>
    %cst_74 = arith.constant 0.000000e+00 : f32
    %155 = vector.broadcast %cst_74 : f32 to vector<64x32xf32>
    %156 = arith.select %154, %152, %155 : vector<64x32xi1>, vector<64x32xf32>
    %157 = arith.addf %150, %156 : vector<64x32xf32>
    %158 = vector.extract_strided_slice %129 {offsets = [0, 160], sizes = [64, 32], strides = [1, 1]} : vector<64x224xf32> to vector<64x32xf32>
    %159 = arith.addf %157, %158 : vector<64x32xf32>
    %160 = tpu.concatenate %144, %159 in 1 : vector<64x32xf32>, vector<64x32xf32> -> vector<64x64xf32>
    %c2_75 = arith.constant 2 : index
    %c0_76 = arith.constant 0 : index
    %c0_77 = arith.constant 0 : index
    %161 = vector.load %arg5[%c2_75, %c0_76, %c0_77] : memref<3x1x64xf32, #tpu.memory_space<vmem>>, vector<1x1x64xf32>
    %162 = vector.shape_cast %161 : vector<1x1x64xf32> to vector<1x64xf32>
    %163 = vector.broadcast %162 : vector<1x64xf32> to vector<64x64xf32>
    %164 = arith.addf %160, %163 : vector<64x64xf32>
    %cst_78 = arith.constant 0.000000e+00 : f32
    %165 = vector.broadcast %cst_78 : f32 to vector<64x64xf32>
    %166 = arith.maximumf %164, %165 : vector<64x64xf32>
    %c2_79 = arith.constant 2 : index
    %c0_80 = arith.constant 0 : index
    %c0_81 = arith.constant 0 : index
    %167 = vector.load %arg6[%c2_79, %c0_80, %c0_81] : memref<3x64x32xf32, #tpu.memory_space<vmem>>, vector<1x64x32xf32>
    %168 = vector.shape_cast %167 : vector<1x64x32xf32> to vector<64x32xf32>
    %cst_82 = arith.constant dense<0.000000e+00> : vector<64x32xf32>
    %169 = tpu.matmul %166, %168, %cst_82 {dimension_numbers = #tpu.dot_dimension_numbers<[1], [0], [0], [1], [0, 0, 1, 1], [], []>} : vector<64x64xf32>, vector<64x32xf32>, vector<64x32xf32> -> vector<64x32xf32>
    %170 = vector.extract_strided_slice %129 {offsets = [0, 192], sizes = [64, 32], strides = [1, 1]} : vector<64x224xf32> to vector<64x32xf32>
    %171 = arith.addf %169, %170 : vector<64x32xf32>
    %c2_83 = arith.constant 2 : index
    %c0_84 = arith.constant 0 : index
    %c0_85 = arith.constant 0 : index
    %172 = vector.load %arg7[%c2_83, %c0_84, %c0_85] : memref<3x1x32xf32, #tpu.memory_space<vmem>>, vector<1x1x32xf32>
    %173 = vector.shape_cast %172 : vector<1x1x32xf32> to vector<1x32xf32>
    %174 = vector.broadcast %173 : vector<1x32xf32> to vector<64x32xf32>
    %175 = arith.addf %171, %174 : vector<64x32xf32>
    %cst_86 = arith.constant 0.000000e+00 : f32
    %176 = vector.broadcast %cst_86 : f32 to vector<64x32xf32>
    %177 = arith.maximumf %175, %176 : vector<64x32xf32>
    %178 = arith.addf %177, %126 : vector<64x32xf32>
    %c0_87 = arith.constant 0 : index
    %c0_88 = arith.constant 0 : index
    %179 = vector.load %arg8[%c0_87, %c0_88] : memref<32x8xf32, #tpu.memory_space<vmem>>, vector<32x8xf32>
    %cst_89 = arith.constant dense<0.000000e+00> : vector<64x8xf32>
    %180 = tpu.matmul %178, %179, %cst_89 {dimension_numbers = #tpu.dot_dimension_numbers<[1], [0], [0], [1], [0, 0, 1, 1], [], []>} : vector<64x32xf32>, vector<32x8xf32>, vector<64x8xf32> -> vector<64x8xf32>
    %c0_90 = arith.constant 0 : index
    %c0_91 = arith.constant 0 : index
    %181 = vector.load %arg9[%c0_90, %c0_91] : memref<1x8xf32, #tpu.memory_space<vmem>>, vector<1x8xf32>
    %182 = vector.broadcast %181 : vector<1x8xf32> to vector<64x8xf32>
    %183 = arith.addf %180, %182 : vector<64x8xf32>
    %cst_92 = arith.constant 0.000000e+00 : f32
    %184 = vector.broadcast %cst_92 : f32 to vector<64x88xf32>
    %185 = tpu.concatenate %178, %183, %184 in 1 : vector<64x32xf32>, vector<64x8xf32>, vector<64x88xf32> -> vector<64x128xf32>
    %c0_93 = arith.constant 0 : index
    %c0_94 = arith.constant 0 : index
    %186 = vector.load %arg10[%c0_93, %c0_94] : memref<64x128xf32, #tpu.memory_space<vmem>>, vector<64x128xf32>
    tpu.vector_store %arg10[%c0_93, %c0_94], %185 {strides = array<i32>} : memref<64x128xf32, #tpu.memory_space<vmem>>, vector<64x128xf32>,
    return
  }
  func.func @transform_0(%arg0: i32) -> (i32, i32) {
    %c0_i32 = arith.constant 0 : i32
    %c0_i32_0 = arith.constant 0 : i32
    return %arg0, %c0_i32 : i32, i32
  }
  func.func @transform_1(%arg0: i32) -> (i32, i32) {
    %c0_i32 = arith.constant 0 : i32
    %c0_i32_0 = arith.constant 0 : i32
    %c0_i32_1 = arith.constant 0 : i32
    return %c0_i32, %c0_i32_0 : i32, i32
  }
  func.func @transform_2(%arg0: i32) -> (i32, i32) {
    %c0_i32 = arith.constant 0 : i32
    %c0_i32_0 = arith.constant 0 : i32
    %c0_i32_1 = arith.constant 0 : i32
    return %c0_i32, %c0_i32_0 : i32, i32
  }
  func.func @transform_3(%arg0: i32) -> (i32, i32, i32) {
    %c0_i32 = arith.constant 0 : i32
    %c0_i32_0 = arith.constant 0 : i32
    %c0_i32_1 = arith.constant 0 : i32
    %c0_i32_2 = arith.constant 0 : i32
    return %c0_i32, %c0_i32_0, %c0_i32_1 : i32, i32, i32
  }
  func.func @transform_4(%arg0: i32) -> (i32, i32, i32) {
    %c0_i32 = arith.constant 0 : i32
    %c0_i32_0 = arith.constant 0 : i32
    %c0_i32_1 = arith.constant 0 : i32
    %c0_i32_2 = arith.constant 0 : i32
    return %c0_i32, %c0_i32_0, %c0_i32_1 : i32, i32, i32
  }
  func.func @transform_5(%arg0: i32) -> (i32, i32, i32) {
    %c0_i32 = arith.constant 0 : i32
    %c0_i32_0 = arith.constant 0 : i32
    %c0_i32_1 = arith.constant 0 : i32
    %c0_i32_2 = arith.constant 0 : i32
    return %c0_i32, %c0_i32_0, %c0_i32_1 : i32, i32, i32
  }
  func.func @transform_6(%arg0: i32) -> (i32, i32, i32) {
    %c0_i32 = arith.constant 0 : i32
    %c0_i32_0 = arith.constant 0 : i32
    %c0_i32_1 = arith.constant 0 : i32
    %c0_i32_2 = arith.constant 0 : i32
    return %c0_i32, %c0_i32_0, %c0_i32_1 : i32, i32, i32
  }
  func.func @transform_7(%arg0: i32) -> (i32, i32) {
    %c0_i32 = arith.constant 0 : i32
    %c0_i32_0 = arith.constant 0 : i32
    %c0_i32_1 = arith.constant 0 : i32
    return %c0_i32, %c0_i32_0 : i32, i32
  }
  func.func @transform_8(%arg0: i32) -> (i32, i32) {
    %c0_i32 = arith.constant 0 : i32
    %c0_i32_0 = arith.constant 0 : i32
    %c0_i32_1 = arith.constant 0 : i32
    return %c0_i32, %c0_i32_0 : i32, i32
  }
  func.func @transform_9(%arg0: i32) -> (i32, i32) {
    %c0_i32 = arith.constant 0 : i32
    %c0_i32_0 = arith.constant 0 : i32
    return %arg0, %c0_i32 : i32, i32
  }
}

</mosaic_0001>

<bundles_post_ra>
// kernel: tpu_custom_call.1
= control target key start
LH: loop header
LB: loop body
LE: loop exit
PB: predicated region body
PF: predicated region fallthrough
CT: control target
= control target key end

     0   :  { %14 = vsyncpa [#allocation3], 0  ;;  %s4621_s0 = inlined_call_operand.vmem [shape: f32[128,16], index: 0, kind: input, shape index: {}]   ;;  %s4622_s1 = inlined_call_operand.vmem [shape: f32[16,32], index: 1, kind: input, shape index: {}]   ;;  %s4623_s2 = inlined_call_operand.vmem [shape: f32[1,32], index: 2, kind: input, shape index: {}]   ;;  %s4624_s3 = inlined_call_operand.vmem [shape: f32[3,32,224], index: 3, kind: input, shape index: {}]   ;;  %s4625_s4 = inlined_call_operand.vmem [shape: f32[3,1,64], index: 4, kind: input, shape index: {}]   ;;  %s4626_s5 = inlined_call_operand.vmem [shape: f32[3,64,32], index: 5, kind: input, shape index: {}]   ;;  %s4627_s6 = inlined_call_operand.vmem [shape: f32[3,1,32], index: 6, kind: input, shape index: {}]   ;;  %s4628_s7 = inlined_call_operand.vmem [shape: f32[32,8], index: 7, kind: input, shape index: {}]   ;;  %s4629_s8 = inlined_call_operand.vmem [shape: f32[1,8], index: 8, kind: input, shape index: {}]   ;;  %s4630_s9 = inlined_call_operand.hbm [shape: f32[128,128], index: 9, kind: output, shape index: {}]  }
   0x1   :  { %16 = vsyncpa [#allocation3 + $0x1], 0  ;;  %s3361_s30 = smov 0   ;;  %s3363_s10 = smov 0  }
   0x2   :  { %s3365_s11 = smov 0   ;;  %s3367_s12 = smov 0  }
   0x3 LB: > { %s3382_s13 = sadd.s32 4294967295, %s3302_s12   ;;  %s2792_s14 = sadd.s32 4294967294, %s3302_s12   ;;  %s3302_s12 = sphi %s3367_s12, %s4639_s12   ;;  %s3298_s11 = sphi %s3365_s11, %s4638_s11   ;;  %s3294_s10 = sphi %s3363_s10, %s4637_s10   ;;  %s3290_s30 = sphi %s3361_s30, %s4636_s30  }
   0x4   : > { %s3386_s15 = sadd.s32 1, %s3302_s12   ;;  %s223_s16 = sadd.s32 1, %s3298_s11 }
   0x5   : > { %s220_s17 = ssub.s32 %s3302_s12, %s3386_s15  ;;  %p233_p0 = scmp.ne.s32.totalorder %s3298_s11, %s3294_s10 }
   0x6   : > { %p221_p1 = scmp.eq.s32.totalorder %s220_s17, 0  ;;  %p234_p2 = scmp.eq.s32.totalorder %s3382_s13, 1 }
   0x7   : > { %p239_p3 = scmp.ne.s32.totalorder %s3294_s10, %s3290_s30  ;;  %p240_p4 = scmp.eq.s32.totalorder %s2792_s14, 1 }
   0x8   : > { %s3397_s18 = scalar_select %p221_p1, %s3298_s11, %s223_s16  }
   0x9   : > { %p3399_p5 = por %p234_p2, %p233_p0  ;;  %p3403_p6 = por %p240_p4, %p239_p3 }
   0xa   : > { %p2795_p7 = scmp.ge.s32.totalorder %s3302_s12, 1  ;;  %p291_p8 = scmp.lt.s32.totalorder %s3302_s12, 3 }
   0xc   : > { %p292_p9 = pnand %p2795_p7, %p291_p8 }
   0xd   : > { %v447_v0 = vld [vmem:[%s4622_s1] sm:$0xff] (!%p292_p9)  ;;  %v448_v1 = vld [vmem:[%s4622_s1 + $0x8] sm:$0xff] (!%p292_p9)  ;;  %s2797_s25 = sshll.u32 (!%p292_p9), %s3382_s13, 3  ;;  %v589_v4 = vld [vmem:[%s4624_s3 + $0x18] sm:$0xff] (!%p292_p9)  ;;  %vm456_vm0 = vcmask (!%p292_p9), 130048   ;;  %v3304_v23 = vmov (!%p292_p9), 0.0   ;;  %v334_v41 = vlaneseq (!%p292_p9) }
   0xe   : > { %295 = sbr.rel (%p292_p9) target bundleno = 2709 (0xa95), region = 56  ;;  %v587_v2 = vld [vmem:[%s4624_s3 + $0x8] sm:$0xff] (!%p292_p9)  ;;  %v3103_v3 = vpack.c.bf16 (!%p292_p9), %v448_v1, %v447_v0  ;;  %p328_p10 = scmp.lt.s32.totalorder (!%p292_p9), %s2797_s25, 15  ;;  %v586_v5 = vld [vmem:[%s4624_s3] sm:$0xff] (!%p292_p9)  ;;  %v588_v6 = vld [vmem:[%s4624_s3 + $0x10] sm:$0xff] (!%p292_p9)  ;;  %683 = vmatprep.mubr.f32.mxu1 (!%p292_p9), %v3304_v23  ;;  %vm594_vm1 = vcmask (!%p292_p9), 261120  }
   0xf   : > { %v3107_v7 = vpack.c.bf16 (!%p292_p9), %v589_v4, %v587_v2  ;;  %v3109_v8 = vpack.c.bf16 (!%p292_p9), %v588_v6, %v586_v5  ;;  %v591_v17 = vld [vmem:[%s4624_s3 + $0x28] sm:$0xff] (!%p292_p9)  ;;  %v593_v18 = vld [vmem:[%s4624_s3 + $0x38] sm:$0xff] (!%p292_p9)  ;;  %v590_v20 = vld [vmem:[%s4624_s3 + $0x20] sm:$0xff] (!%p292_p9)  ;;  %s3305_s24 = smov (!%p292_p9), 32   ;;  %v3500_v44 = vshrl.u32 (!%p292_p9), %v334_v41, 7  ;;  %vm1086_vm8 = vcmask (!%p292_p9), 523264  }
  0x10   : > { %3104 = vmatprep.subr.bf16.mxu0 (!%p292_p9), %v3103_v3  ;;  %v3111_v19 = vpack.c.bf16 (!%p292_p9), %v593_v18, %v591_v17  ;;  %v592_v21 = vld [vmem:[%s4624_s3 + $0x30] sm:$0xff] (!%p292_p9)  ;;  %v2799_v24 = vld [vmem:[%s4623_s2] ss:$0 sm:$0xff] (!%p292_p9)  ;;  %s4635_s17 = smov (!%p292_p9), 96   ;;  %s324_s16 = sand.u32 (!%p292_p9), 1, %s3294_s10   ;;  %vm2699_vm9 = vcmask (!%p292_p9), 326656  }
  0x11   : > { %3106 = vmatpush3.bf16.msra.mxu0 (!%p292_p9), %v3103_v3  ;;  %3108 = vmatprep.subr.bf16.mxu1 (!%p292_p9), %v3107_v7  ;;  %v3113_v22 = vpack.c.bf16 (!%p292_p9), %v592_v21, %v590_v20  ;;  %vm918_vm2 = vcmp.lt.s32.totalorder (!%p292_p9), %v3500_v44, 1  ;;  %v1058_v20 = vld [vmem:[%s4626_s5 + $0x20] sm:$0xff] (!%p292_p9)  ;;  %v1059_v21 = vld [vmem:[%s4626_s5 + $0x28] sm:$0xff] (!%p292_p9)  ;;  %vm885_vm3 = vcmp.lt.s32.totalorder (!%p292_p9), %v3500_v44, 2  ;;  %vm788_vm6 = vcmp.lt.s32.totalorder (!%p292_p9), %v3500_v44, 4  ;;  %s2796_s21 = sshll.u32 (!%p292_p9), %s324_s16, 6 }
  0x12   : > { %3110 = vmatpush1.bf16.msra.mxu1 (!%p292_p9), %v3109_v8 }
  0x13   : > { %3112 = vmatprep.subr.bf16.mxu1 (!%p292_p9), %v3111_v19 }
  0x15   : > { %s4641_s25 = smov (!%p328_p10, %s2797_s25), 15 }
  0x16   : > { %s2798_s22 = sshll.u32 %s4641_s25, 3  ;;  %3114 = vmatpush1.bf16.msra.mxu1 %v3113_v22  ;;  %s3307_s25 = smov 64   ;;  %v3123_v22 = vpack.c.bf16 %v1059_v21, %v1058_v20 }
  0x17   : > { %s331_s26 = scalar_lea.vmem %s4621_s0, %s2798_s22  ;;  %s4542_s22 = scalar_lea.vmem [#allocation2], %s2796_s21 }
  0x18   : > { %v439_v9 = vld [vmem:[%s331_s26] sm:$0xff]  ;;  %v440_v10 = vld [vmem:[%s331_s26 + $0x8] sm:$0xff]  ;;  %v441_v11 = vld [vmem:[%s331_s26 + $0x10] sm:$0xff]  ;;  %s2730_s23 = sshll.u32 %s4542_s22, 4  ;;  %s4570_s23 = int_to_ptr.vmem [resolvable:$true] %s2730_s23 }
  0x19   : > { %2987 = vmatprep.mubr.msk.f32.mxu0 %vm456_vm0, %v439_v9  ;;  %v442_v12 = vld [vmem:[%s331_s26 + $0x18] sm:$0xff]  ;;  %v443_v13 = vld [vmem:[%s331_s26 + $0x20] sm:$0xff]  ;;  %v444_v14 = vld [vmem:[%s331_s26 + $0x28] sm:$0xff] }
  0x1a   : > { %2988 = vmatmul.mubr.msk.f32.vlgmr.msra.gmra.mrb[0].mxu0 %vm456_vm0, %v440_v10  ;;  %v445_v15 = vld [vmem:[%s331_s26 + $0x30] sm:$0xff]  ;;  %v446_v16 = vld [vmem:[%s331_s26 + $0x38] sm:$0xff]  ;;  %s4631_s26 = smov 96  }
  0x1b   : > { %2990 = vmatprep.mubr.msk.f32.mxu0 %vm456_vm0, %v441_v11  ;;  %v1054_v11 = vld [vmem:[%s4626_s5] sm:$0xff] }
  0x1e   : > { %2991 = vmatmul.mubr.msk.f32.gmra.mrb[2].mxu0 %vm456_vm0, %v442_v12  ;;  %v1055_v12 = vld [vmem:[%s4626_s5 + $0x8] sm:$0xff] }
  0x1f   : > { %2993 = vmatprep.mubr.msk.f32.mxu0 %vm456_vm0, %v443_v13  ;;  %v1056_v13 = vld [vmem:[%s4626_s5 + $0x10] sm:$0xff] }
  0x22   : > { %2994 = vmatmul.mubr.msk.f32.gmra.mrb[4].mxu0 %vm456_vm0, %v444_v14  ;;  %v3115_v14 = vpack.c.bf16 %v1055_v12, %v1054_v11 }
  0x23   : > { %2996 = vmatprep.mubr.msk.f32.mxu0 %vm456_vm0, %v445_v15  ;;  %v1057_v15 = vld [vmem:[%s4626_s5 + $0x18] sm:$0xff] }
  0x24   : > { %3116 = vmatprep.subr.bf16.mxu0 %v3115_v14 }
  0x25   : > { %3118 = vmatpush3.bf16.msra.mxu0 %v3115_v14 }
  0x26   : > { %2997 = vmatmul.mubr.msk.f32.gmra.mrb[6].mxu0 %vm456_vm0, %v446_v16  ;;  %v3119_v16 = vpack.c.bf16 %v1057_v15, %v1056_v13 }
  0x28   : > { %3120 = vmatprep.subr.bf16.mxu0 %v3119_v16 }
  0x29   : > { %3122 = vmatpush3.bf16.msra.mxu0 %v3119_v16 }
  0x2a   : > { %3124 = vmatprep.subr.bf16.mxu0 %v3123_v22 }
  0x2d   : > { %3126 = vmatpush3.bf16.msra.mxu0 %v3123_v22 }
  0xed   : > { %v2989_v25 = vpop.f32.mrb[0].mxu0 }
  0xee   : > { %v547_v26 = vpop.f32.mrb[1].mxu0  ;;  %v3460_v30 = vadd.f32 %v2989_v25, %v2799_v24 }
  0xef   : > { %v3455_v27 = vadd.f32 %v2799_v24, %v547_v26 }
  0xf1   : > { %2808 = vmatmul.mubr.msk.f32.vlgmr.msra.gmra.mrb[0].mxu1 %vm594_vm1, %v3455_v27  ;;  %v2992_v28 = vpop.f32.mrb[2].mxu0 }
  0xf2   : > { %689 = vmatprep.mubr.f32.mxu1 %v3304_v23  ;;  %v557_v29 = vpop.f32.mrb[3].mxu0  ;;  %v3470_v36 = vadd.f32 %v2992_v28, %v2799_v24  ;;  %v3649_v28 = vand.u32 63, %v3500_v44 }
  0xf3   : > { %v3462_v31 = vadd.f32 %v2799_v24, %v557_v29  ;;  %v1060_v29 = vld [vmem:[%s4626_s5 + $0x30] sm:$0xff] }
  0xf4   : > { %vm894_vm4 = vcmp.ge.s32.totalorder %v3649_v28, 2  ;;  %vm927_vm5 = vcmp.ge.s32.totalorder %v3649_v28, 1  ;;  %vm797_vm7 = vcmp.ge.s32.totalorder %v3649_v28, 4 }
  0xf5   : > { %2809 = vmatmul.mubr.msk.f32.gmra.mrb[2].mxu1 %vm594_vm1, %v3460_v30  ;;  %v2995_v32 = vpop.f32.mrb[4].mxu0 }
  0xf6   : > { %695 = vmatprep.mubr.f32.mxu1 %v3304_v23  ;;  %v567_v33 = vpop.f32.mrb[5].mxu0  ;;  %v3480_v38 = vadd.f32 %v2995_v32, %v2799_v24  ;;  %v1061_v32 = vld [vmem:[%s4626_s5 + $0x38] sm:$0xff] }
  0xf7   : > { %v3472_v37 = vadd.f32 %v2799_v24, %v567_v33 }
  0xf9   : > { %2810 = vmatmul.mubr.msk.f32.gmra.mrb[4].mxu1 %vm594_vm1, %v3462_v31  ;;  %v2998_v34 = vpop.f32.mrb[6].mxu0 }
  0xfa   : > { %701 = vmatprep.mubr.f32.mxu1 %v3304_v23  ;;  %v577_v35 = vpop.f32.mrb[7].mxu0  ;;  %v3490_v40 = vadd.f32 %v2998_v34, %v2799_v24  ;;  %v3127_v34 = vpack.c.bf16 %v1061_v32, %v1060_v29 }
  0xfb   : > { %v3482_v39 = vadd.f32 %v2799_v24, %v577_v35 }
  0xfc   : > { %3128 = vmatprep.subr.bf16.mxu0 %v3127_v34 }
  0xfd   : > { %2811 = vmatmul.mubr.msk.f32.gmra.mrb[6].mxu1 %vm594_vm1, %v3470_v36  ;;  %3130 = vmatpush3.bf16.msra.mxu0 %v3127_v34 }
  0xfe   : > { %707 = vmatprep.mubr.f32.mxu1 %v3304_v23 }
 0x101   : > { %2812 = vmatmul.mubr.msk.f32.gmra.mrb[8].mxu1 %vm594_vm1, %v3472_v37 }
 0x102   : > { %713 = vmatprep.mubr.f32.mxu1 %v3304_v23 }
 0x105   : > { %2813 = vmatmul.mubr.msk.f32.gmra.mrb[10].mxu1 %vm594_vm1, %v3480_v38 }
 0x106   : > { %719 = vmatprep.mubr.f32.mxu1 %v3304_v23 }
 0x109   : > { %2814 = vmatmul.mubr.msk.f32.gmra.mrb[12].mxu1 %vm594_vm1, %v3482_v39 }
 0x10a   : > { %725 = vmatprep.mubr.f32.mxu1 %v3304_v23 }
 0x10d   : > { %2815 = vmatmul.mubr.msk.f32.gmra.mrb[14].mxu1 %vm594_vm1, %v3490_v40 }
 0x1c4   : > { %v3494_v42 = vpop.f32.mrb[0].mxu1 }
 0x1c5   : > { %853 = vrot.lane.b32.xlu0 %v3494_v42, %s3305_s24  ;;  %v3498_v43 = vpop.f32.mrb[1].mxu1 }
 0x1c6   : > { %v910_v47 = vrot.slane %v3498_v43, 7 }
 0x1c8   : > { %v3502_v45 = vpop.f32.mrb[2].mxu1 }
 0x1c9   : > { %855 = vrot.lane.b32.xlu1 %v3502_v45, %s3305_s24  ;;  %v3506_v46 = vpop.f32.mrb[3].mxu1 }
 0x1ca   : > { %v911_v48 = vrot.slane %v3506_v46, 7 }
 0x1cc   : > { %v3511_v49 = vpop.f32.mrb[4].mxu1  ;;  %v3515_v50 = vsel %vm918_vm2, %v910_v47, %v911_v48 }
 0x1cd   : > { %959 = vrot.lane.b32.xlu1 %v3498_v43, %s4631_s26  ;;  %v3519_v51 = vpop.f32.mrb[5].mxu1 }
 0x1ce   : > { %v912_v52 = vrot.slane %v3519_v51, 7 }
 0x1d0   : > { %v3522_v53 = vpop.f32.mrb[6].mxu1  ;;  %v3526_v54 = vsel %vm918_vm2, %v911_v48, %v912_v52 }
 0x1d1   : > { %857 = vrot.lane.b32.xlu1 %v3511_v49, %s3305_s24  ;;  %v3530_v55 = vpop.f32.mrb[7].mxu1 }
 0x1d2   : > { %v913_v56 = vrot.slane %v3530_v55, 7 }
 0x1d4   : > { %v3533_v57 = vpop.f32.mrb[8].mxu1  ;;  %v3537_v58 = vsel %vm918_vm2, %v912_v52, %v913_v56 }
 0x1d5   : > { %963 = vrot.lane.b32.xlu1 %v3519_v51, %s4631_s26  ;;  %v3541_v59 = vpop.f32.mrb[9].mxu1 }
 0x1d6   : > { %v914_v60 = vrot.slane %v3541_v59, 7 }
 0x1d8   : > { %v3544_v61 = vpop.f32.mrb[10].mxu1  ;;  %v3548_v62 = vsel %vm918_vm2, %v913_v56, %v914_v60 }
 0x1d9   : > { %861 = vrot.lane.b32.xlu1 %v3533_v57, %s3305_s24  ;;  %v3552_v63 = vpop.f32.mrb[11].mxu1 }
 0x1da   : > { %v915_v0 = vrot.slane %v3552_v63, 7 }
 0x1dc   : > { %v3555_v1 = vpop.f32.mrb[12].mxu1  ;;  %v3559_v2 = vsel %vm918_vm2, %v914_v60, %v915_v0 }
 0x1dd   : > { %967 = vrot.lane.b32.xlu1 %v3541_v59, %s4631_s26  ;;  %v3563_v3 = vpop.f32.mrb[13].mxu1 }
 0x1de   : > { %v916_v4 = vrot.slane %v3563_v3, 7 }
 0x1e0   : > { %v3566_v5 = vpop.f32.mrb[14].mxu1  ;;  %v3570_v6 = vsel %vm918_vm2, %v915_v0, %v916_v4 }
 0x1e1   : > { %865 = vrot.lane.b32.xlu1 %v3555_v1, %s3305_s24  ;;  %867 = vrot.lane.b32.xlu0 %v3566_v5, %s3305_s24  ;;  %v3576_v7 = vpop.f32.mrb[15].mxu1 }
 0x1e2   : > { %v917_v8 = vrot.slane %v3576_v7, 7 }
 0x1e4   : > { %v3581_v9 = vsel %vm918_vm2, %v916_v4, %v917_v8  ;;  %v3585_v10 = vsel %vm918_vm2, %v917_v8, %v910_v47 }
 0x1e5   : > { %961 = vrot.lane.b32.xlu0 %v3506_v46, %s4631_s26  ;;  %973 = vrot.lane.b32.xlu1 %v3576_v7, %s4631_s26  ;;  %v935_v8 = vsel %vm927_vm5, %v3585_v10, 0.0 }
 0x1e9   : > { %859 = vrot.lane.b32.xlu0 %v3522_v53, %s3305_s24  ;;  %758 = vrot.lane.b32.xlu1 %v3502_v45, %s4631_s26 }
 0x1ed   : > { %965 = vrot.lane.b32.xlu0 %v3530_v55, %s4631_s26  ;;  %821 = vrot.lane.b32.xlu1 %v3494_v42, %s3307_s25 }
 0x1f1   : > { %863 = vrot.lane.b32.xlu0 %v3544_v61, %s3305_s24  ;;  %825 = vrot.lane.b32.xlu1 %v3511_v49, %s3307_s25 }
 0x1f5   : > { %969 = vrot.lane.b32.xlu0 %v3552_v63, %s4631_s26 }
 0x1f9   : > { %971 = vrot.lane.b32.xlu0 %v3563_v3, %s4631_s26 }
 0x1fd   : > { %756 = vrot.lane.b32.xlu0 %v3494_v42, %s4631_s26 }
 0x201   : > { %770 = vrot.lane.b32.xlu0 %v3566_v5, %s4631_s26 }
 0x205   : > { %823 = vrot.lane.b32.xlu0 %v3502_v45, %s3307_s25 }
 0x209   : > { %760 = vrot.lane.b32.xlu0 %v3511_v49, %s4631_s26 }
 0x20d   : > { %762 = vrot.lane.b32.xlu0 %v3522_v53, %s4631_s26 }
 0x211   : > { %827 = vrot.lane.b32.xlu0 %v3522_v53, %s3307_s25 }
 0x215   : > { %764 = vrot.lane.b32.xlu0 %v3533_v57, %s4631_s26 }
 0x219   : > { %766 = vrot.lane.b32.xlu0 %v3544_v61, %s4631_s26 }
 0x21d   : > { %831 = vrot.lane.b32.xlu0 %v3544_v61, %s3307_s25 }
 0x221   : > { %768 = vrot.lane.b32.xlu0 %v3555_v1, %s4631_s26 }
 0x225   : > { %833 = vrot.lane.b32.xlu0 %v3555_v1, %s3307_s25 }
 0x237   : > { %v854_v24 = vpop.permute.xlu0 %853 }
 0x238   : > { %v877_v33 = vrot.slane %v854_v24, 6 }
 0x23b   : > { %v856_v17 = vpop.permute.xlu1 %855 }
 0x23c   : > { %v878_v25 = vrot.slane %v856_v17, 6 }
 0x23e   : > { %v892_v41 = vsel %vm885_vm3, %v877_v33, %v878_v25 }
 0x23f   : > { %v960_v18 = vpop.permute.xlu1 %959  ;;  %v944_v60 = vadd.f32 %v3515_v50, %v892_v41 }
 0x243   : > { %v858_v19 = vpop.permute.xlu1 %857 }
 0x244   : > { %v879_v48 = vrot.slane %v858_v19, 6 }
 0x246   : > { %v891_v13 = vsel %vm885_vm3, %v878_v25, %v879_v48 }
 0x247   : > { %v964_v26 = vpop.permute.xlu1 %963  ;;  %v945_v15 = vadd.f32 %v3526_v54, %v891_v13 }
 0x249   : > { %v985_v10 = vadd.f32 %v964_v26, %v945_v15 }
 0x24b   : > { %v862_v52 = vpop.permute.xlu1 %861 }
 0x24c   : > { %v881_v24 = vrot.slane %v862_v52, 6 }
 0x24f   : > { %v968_v16 = vpop.permute.xlu1 %967 }
 0x253   : > { %v868_v35 = vpop.permute.xlu0 %867  ;;  %v866_v22 = vpop.permute.xlu1 %865 }
 0x254   : > { %v884_v47 = vrot.slane %v868_v35, 6  ;;  %v883_v54 = vrot.slane %v866_v22, 6 }
 0x256   : > { %v893_v56 = vsel %vm885_vm3, %v884_v47, %v877_v33 }
 0x257   : > { %v962_v0 = vpop.permute.xlu0 %961  ;;  %v902_v4 = vsel %vm894_vm4, %v893_v56, 0.0 }
 0x258   : > { %v984_v11 = vadd.f32 %v962_v0, %v944_v60  ;;  %v943_v12 = vadd.f32 %v935_v8, %v902_v4  ;;  %v974_v0 = vpop.permute.xlu1 %973 }
 0x25a   : > { %1001 = vrot.lane.b32.xlu1 %v984_v11, %s3305_s24  ;;  %v983_v17 = vadd.f32 %v960_v18, %v943_v12 }
 0x25b   : > { %v860_v14 = vpop.permute.xlu0 %859 }
 0x25c   : > { %v880_v50 = vrot.slane %v860_v14, 6  ;;  %v759_v11 = vpop.permute.xlu1 %758 }
 0x25e   : > { %999 = vrot.lane.b32.xlu1 %v983_v17, %s3305_s24  ;;  %v890_v19 = vsel %vm885_vm3, %v879_v48, %v880_v50  ;;  %v889_v18 = vsel %vm885_vm3, %v880_v50, %v881_v24 }
 0x25f   : > { %v966_v20 = vpop.permute.xlu0 %965  ;;  %v946_v21 = vadd.f32 %v3537_v58, %v890_v19  ;;  %v947_v26 = vadd.f32 %v3548_v62, %v889_v18  ;;  %v886_v62 = vsel %vm885_vm3, %v883_v54, %v884_v47 }
 0x261   : > { %v986_v29 = vadd.f32 %v966_v20, %v946_v21  ;;  %v987_v56 = vadd.f32 %v968_v16, %v947_v26  ;;  %v2826_v26 = vld [vmem:[%s4624_s3 + $0x40] sm:$0xff] }
 0x262   : > { %1003 = vrot.lane.b32.xlu1 %v985_v10, %s3305_s24 }
 0x263   : > { %v864_v25 = vpop.permute.xlu0 %863 }
 0x264   : > { %v882_v32 = vrot.slane %v864_v25, 6  ;;  %v3740_v25 = vld [vmem:[%s4625_s4] ss:$0 sm:$0xff] }
 0x266   : > { %1005 = vrot.lane.b32.xlu1 %v986_v29, %s3305_s24  ;;  %v887_v34 = vsel %vm885_vm3, %v882_v32, %v883_v54  ;;  %v888_v58 = vsel %vm885_vm3, %v881_v24, %v882_v32 }
 0x267   : > { %v970_v33 = vpop.permute.xlu0 %969  ;;  %v949_v35 = vadd.f32 %v3570_v6, %v887_v34  ;;  %v948_v48 = vadd.f32 %v3559_v2, %v888_v58  ;;  %v950_v6 = vadd.f32 %v3581_v9, %v886_v62  ;;  %v2829_v9 = vld [vmem:[%s4624_s3 + $0x58] sm:$0xff]  ;;  %v2828_v58 = vld [vmem:[%s4624_s3 + $0x50] sm:$0xff] }
 0x269   : > { %v988_v60 = vadd.f32 %v970_v33, %v948_v48  ;;  %v990_v2 = vadd.f32 %v974_v0, %v950_v6 }
 0x26a   : > { %829 = vrot.lane.b32.xlu1 %v3533_v57, %s3307_s25 }
 0x26b   : > { %v972_v41 = vpop.permute.xlu0 %971 }
 0x26c   : > { %v989_v52 = vadd.f32 %v972_v41, %v949_v35 }
 0x26e   : > { %1011 = vrot.lane.b32.xlu0 %v989_v52, %s3305_s24  ;;  %1007 = vrot.lane.b32.xlu1 %v987_v56, %s3305_s24 }
 0x272   : > { %1062 = vrot.lane.b32.xlu0 %v3498_v43, %s3307_s25  ;;  %1009 = vrot.lane.b32.xlu1 %v988_v60, %s3305_s24  ;;  %v2827_v43 = vld [vmem:[%s4624_s3 + $0x48] sm:$0xff]  ;;  %v3133_v60 = vpack.c.bf16 %v2828_v58, %v2826_v26 }
 0x273   : > { %v3131_v47 = vpack.c.bf16 %v2829_v9, %v2827_v43 }
 0x275   : > { %3132 = vmatprep.subr.bf16.mxu0 %v3131_v47 }
 0x276   : > { %1066 = vrot.lane.b32.xlu0 %v3519_v51, %s3307_s25  ;;  %835 = vrot.lane.b32.xlu1 %v3566_v5, %s3307_s25  ;;  %v757_v51 = vpop.permute.xlu0 %756 }
 0x277   : > { %v780_v13 = vrot.slane %v757_v51, 4 }
 0x27a   : > { %1070 = vrot.lane.b32.xlu0 %v3541_v59, %s3307_s25  ;;  %1013 = vrot.lane.b32.xlu1 %v990_v2, %s3305_s24  ;;  %v3721_v59 = vpop.permute.xlu0 %770 }
 0x27b   : > { %v787_v14 = vrot.slane %v3721_v59, 4  ;;  %v2831_v59 = vld [vmem:[%s4624_s3 + $0x68] sm:$0xff] }
 0x27d   : > { %v796_v50 = vsel %vm788_vm6, %v787_v14, %v780_v13 }
 0x27e   : > { %1074 = vrot.lane.b32.xlu0 %v3563_v3, %s3307_s25  ;;  %1064 = vrot.lane.b32.xlu1 %v3506_v46, %s3307_s25  ;;  %v824_v5 = vpop.permute.xlu0 %823  ;;  %v822_v46 = vpop.permute.xlu1 %821  ;;  %v805_v24 = vsel %vm797_vm7, %v796_v50, 0.0 }
 0x282   : > { %1068 = vrot.lane.b32.xlu1 %v3530_v55, %s3307_s25  ;;  %v761_v4 = vpop.permute.xlu0 %760  ;;  %v781_v55 = vrot.slane %v759_v11, 4  ;;  %v826_v15 = vpop.permute.xlu1 %825 }
 0x283   : > { %v782_v16 = vrot.slane %v761_v4, 4 }
 0x285   : > { %v794_v20 = vsel %vm788_vm6, %v781_v55, %v782_v16 }
 0x286   : > { %1072 = vrot.lane.b32.xlu1 %v3552_v63, %s3307_s25  ;;  %v763_v8 = vpop.permute.xlu0 %762  ;;  %v815_v32 = vadd.f32 %v794_v20, %v3502_v45 }
 0x287   : > { %v783_v10 = vrot.slane %v763_v8, 4 }
 0x288   : > { %v847_v48 = vadd.f32 %v826_v15, %v815_v32 }
 0x289   : > { %v793_v54 = vsel %vm788_vm6, %v782_v16, %v783_v10 }
 0x28a   : > { %1076 = vrot.lane.b32.xlu1 %v3576_v7, %s3307_s25  ;;  %v828_v3 = vpop.permute.xlu0 %827  ;;  %v795_v7 = vsel %vm788_vm6, %v780_v13, %v781_v55  ;;  %v816_v41 = vadd.f32 %v793_v54, %v3511_v49 }
 0x28b   : > { %v814_v17 = vadd.f32 %v795_v7, %v3494_v42  ;;  %v845_v42 = vadd.f32 %v822_v46, %v805_v24 }
 0x28c   : > { %v848_v9 = vadd.f32 %v828_v3, %v816_v41 }
 0x28d   : > { %v846_v19 = vadd.f32 %v824_v5, %v814_v17 }
 0x28e   : > { %v765_v12 = vpop.permute.xlu0 %764 }
 0x28f   : > { %v784_v2 = vrot.slane %v765_v12, 4 }
 0x291   : > { %v792_v11 = vsel %vm788_vm6, %v783_v10, %v784_v2 }
 0x292   : > { %v767_v63 = vpop.permute.xlu0 %766 }
 0x293   : > { %v785_v47 = vrot.slane %v767_v63, 4  ;;  %v817_v63 = vadd.f32 %v792_v11, %v3522_v53 }
 0x295   : > { %v791_v3 = vsel %vm788_vm6, %v784_v2, %v785_v47 }
 0x296   : > { %v832_v21 = vpop.permute.xlu0 %831  ;;  %v818_v7 = vadd.f32 %v791_v3, %v3533_v57 }
 0x29a   : > { %v769_v35 = vpop.permute.xlu0 %768 }
 0x29b   : > { %v786_v62 = vrot.slane %v769_v35, 4 }
 0x29d   : > { %v790_v5 = vsel %vm788_vm6, %v785_v47, %v786_v62  ;;  %v789_v57 = vsel %vm788_vm6, %v786_v62, %v787_v14  ;;  %v2825_v62 = vld [vmem:[%s4627_s6] ss:$0 sm:$0xff] }
 0x29e   : > { %v819_v12 = vadd.f32 %v790_v5, %v3544_v61  ;;  %v834_v46 = vpop.permute.xlu0 %833  ;;  %v850_v61 = vadd.f32 %v832_v21, %v818_v7  ;;  %v820_v21 = vadd.f32 %v789_v57, %v3555_v1  ;;  %v2833_v1 = vld [vmem:[%s4624_s3 + $0x78] sm:$0xff] }
 0x29f   : > { %v3135_v14 = vpack.c.bf16 %v2833_v1, %v2831_v59 }
 0x2a0   : > { %v851_v16 = vadd.f32 %v834_v46, %v819_v12 }
 0x2cc   : > { %v1002_v22 = vpop.permute.xlu1 %1001 }
 0x2cd   : > { %v1024_v29 = vsel %vm594_vm1, %v846_v19, %v1002_v22 }
 0x2ce   : > { %v1039_v33 = vadd.f32 %v3740_v25, %v1024_v29 }
 0x2d0   : > { %v1000_v18 = vpop.permute.xlu1 %999  ;;  %v1047_v6 = vmax.f32 %v1039_v33, 0.0 }
 0x2d1   : > { %v1023_v34 = vsel %vm594_vm1, %v845_v42, %v1000_v18 }
 0x2d2   : > { %v1038_v45 = vadd.f32 %v3740_v25, %v1023_v34 }
 0x2d4   : > { %v1046_v52 = vmax.f32 %v1038_v45, 0.0  ;;  %v1004_v56 = vpop.permute.xlu1 %1003  ;;  %v2830_v45 = vld [vmem:[%s4624_s3 + $0x60] sm:$0xff] }
 0x2d5   : > { %v1025_v0 = vsel %vm594_vm1, %v847_v48, %v1004_v56 }
 0x2d6   : > { %v1040_v43 = vadd.f32 %v3740_v25, %v1025_v0  ;;  %3015 = vmatprep.mubr.msk.f32.mxu0 %vm1086_vm8, %v1046_v52 }
 0x2d7   : > { %3016 = vmatmul.mubr.msk.f32.vlgmr.msra.gmra.mrb[8].mxu0 %vm1086_vm8, %v1047_v6 }
 0x2d8   : > { %v1048_v51 = vmax.f32 %v1040_v43, 0.0  ;;  %v1006_v49 = vpop.permute.xlu1 %1005  ;;  %3134 = vmatpush1.bf16.msra.mxu0 %v3133_v60 }
 0x2d9   : > { %v1026_v4 = vsel %vm594_vm1, %v848_v9, %v1006_v49  ;;  %3136 = vmatprep.subr.bf16.mxu0 %v3135_v14 }
 0x2da   : > { %v1041_v8 = vadd.f32 %v3740_v25, %v1026_v4  ;;  %3018 = vmatprep.mubr.msk.f32.mxu0 %vm1086_vm8, %v1048_v51 }
 0x2dc   : > { %v1049_v13 = vmax.f32 %v1041_v8, 0.0  ;;  %v830_v55 = vpop.permute.xlu1 %829 }
 0x2dd   : > { %v849_v15 = vadd.f32 %v830_v55, %v817_v63 }
 0x2de   : > { %3019 = vmatmul.mubr.msk.f32.gmra.mrb[10].mxu0 %vm1086_vm8, %v1049_v13 }
 0x2e0   : > { %v1012_v50 = vpop.permute.xlu0 %1011  ;;  %v1008_v17 = vpop.permute.xlu1 %1007 }
 0x2e1   : > { %v1027_v19 = vsel %vm594_vm1, %v849_v15, %v1008_v17  ;;  %v1029_v20 = vsel %vm594_vm1, %v851_v16, %v1012_v50 }
 0x2e2   : > { %v1042_v10 = vadd.f32 %v3740_v25, %v1027_v19  ;;  %v1044_v29 = vadd.f32 %v3740_v25, %v1029_v20 }
 0x2e4   : > { %v1050_v22 = vmax.f32 %v1042_v10, 0.0  ;;  %v1010_v24 = vpop.permute.xlu1 %1009  ;;  %v1052_v18 = vmax.f32 %v1044_v29, 0.0  ;;  %v1063_v56 = vpop.permute.xlu0 %1062 }
 0x2e5   : > { %v1028_v53 = vsel %vm594_vm1, %v850_v61, %v1010_v24 }
 0x2e6   : > { %v1043_v32 = vadd.f32 %v3740_v25, %v1028_v53  ;;  %3021 = vmatprep.mubr.msk.f32.mxu0 %vm1086_vm8, %v1050_v22 }
 0x2e8   : > { %v1051_v42 = vmax.f32 %v1043_v32, 0.0  ;;  %v836_v54 = vpop.permute.xlu1 %835  ;;  %v1067_v49 = vpop.permute.xlu0 %1066 }
 0x2e9   : > { %v852_v33 = vadd.f32 %v836_v54, %v820_v21 }
 0x2ea   : > { %3022 = vmatmul.mubr.msk.f32.gmra.mrb[12].mxu0 %vm1086_vm8, %v1051_v42 }
 0x2eb   : > { %3024 = vmatprep.mubr.msk.f32.mxu0 %vm1086_vm8, %v1052_v18 }
 0x2ec   : > { %v1014_v34 = vpop.permute.xlu1 %1013 }
 0x2ed   : > { %v1030_v26 = vsel %vm594_vm1, %v852_v33, %v1014_v34 }
 0x2ee   : > { %v1045_v58 = vadd.f32 %v3740_v25, %v1030_v26  ;;  %v2832_v25 = vld [vmem:[%s4624_s3 + $0x70] sm:$0xff] }
 0x2ef   : > { %v3137_v41 = vpack.c.bf16 %v2832_v25, %v2830_v45 }
 0x2f0   : > { %v1053_v35 = vmax.f32 %v1045_v58, 0.0  ;;  %v1065_v48 = vpop.permute.xlu1 %1064 }
 0x2f1   : > { %3138 = vmatpush1.bf16.msra.mxu0 %v3137_v41 }
 0x2f2   : > { %3025 = vmatmul.mubr.msk.f32.gmra.mrb[14].mxu0 %vm1086_vm8, %v1053_v35 }
 0x2f3   : > { %1344 = vmatprep.mubr.f32.mxu0 %v3304_v23 }
 0x2f4   : > { %v1069_v47 = vpop.permute.xlu1 %1068 }
 0x2f8   : > { %v1073_v7 = vpop.permute.xlu1 %1072 }
 0x2fc   : > { %v1077_v61 = vpop.permute.xlu1 %1076 }
 0x3aa   : > { %v3017_v52 = vpop.f32.mrb[8].mxu0 }
 0x3ab   : > { %v1183_v60 = vadd.f32 %v3017_v52, %v1065_v48  ;;  %v1177_v6 = vpop.f32.mrb[9].mxu0 }
 0x3ac   : > { %v1178_v0 = vadd.f32 %v1177_v6, %v1063_v56 }
 0x3ad   : > { %v1224_v2 = vadd.f32 %v2825_v62, %v1183_v60 }
 0x3ae   : > { %v1223_v43 = vadd.f32 %v2825_v62, %v1178_v0 }
 0x3af   : > { %v1232_v5 = vmax.f32 %v1224_v2, 0.0 }
 0x3b0   : > { %v1231_v9 = vmax.f32 %v1223_v43, 0.0 }
 0x3b1   : > { %v3020_v51 = vpop.f32.mrb[10].mxu0  ;;  %v3813_v46 = vadd.f32 %v1232_v5, %v3460_v30  ;;  %v1071_v30 = vpop.permute.xlu0 %1070 }
 0x3b2   : > { %v3807_v4 = vadd.f32 %v1231_v9, %v3455_v27  ;;  %v1193_v8 = vadd.f32 %v3020_v51, %v1069_v47  ;;  %v1187_v11 = vpop.f32.mrb[11].mxu0 }
 0x3b3   : > { %v1188_v3 = vadd.f32 %v1187_v11, %v1067_v49 }
 0x3b4   : > { %2834 = vmatmul.mubr.msk.f32.vlgmr.msra.gmra.mrb[16].mxu0 %vm594_vm1, %v3807_v4  ;;  %v1226_v13 = vadd.f32 %v2825_v62, %v1193_v8 }
 0x3b5   : > { %v1225_v12 = vadd.f32 %v2825_v62, %v1188_v3  ;;  %1350 = vmatprep.mubr.f32.mxu0 %v3304_v23  ;;  %v1075_v53 = vpop.permute.xlu0 %1074 }
 0x3b6   : > { %v1234_v63 = vmax.f32 %v1226_v13, 0.0 }
 0x3b7   : > { %v1233_v55 = vmax.f32 %v1225_v12, 0.0 }
 0x3b8   : > { %2835 = vmatmul.mubr.msk.f32.gmra.mrb[18].mxu0 %vm594_vm1, %v3813_v46  ;;  %v3825_v16 = vadd.f32 %v1234_v63, %v3470_v36 }
 0x3b9   : > { %v3818_v27 = vadd.f32 %v1233_v55, %v3462_v31  ;;  %1356 = vmatprep.mubr.f32.mxu0 %v3304_v23 }
 0x3bc   : > { %2836 = vmatmul.mubr.msk.f32.gmra.mrb[20].mxu0 %vm594_vm1, %v3818_v27 }
 0x3bd   : > { %v3023_v15 = vpop.f32.mrb[12].mxu0  ;;  %1362 = vmatprep.mubr.f32.mxu0 %v3304_v23 }
 0x3be   : > { %v1203_v50 = vadd.f32 %v3023_v15, %v1073_v7  ;;  %v1197_v17 = vpop.f32.mrb[13].mxu0 }
 0x3bf   : > { %v1198_v19 = vadd.f32 %v1197_v17, %v1071_v30 }
 0x3c0   : > { %2837 = vmatmul.mubr.msk.f32.gmra.mrb[22].mxu0 %vm594_vm1, %v3825_v16  ;;  %v1228_v31 = vadd.f32 %v2825_v62, %v1203_v50 }
 0x3c1   : > { %v1227_v20 = vadd.f32 %v2825_v62, %v1198_v19  ;;  %1368 = vmatprep.mubr.f32.mxu0 %v3304_v23 }
 0x3c2   : > { %v1236_v22 = vmax.f32 %v1228_v31, 0.0 }
 0x3c3   : > { %v1235_v10 = vmax.f32 %v1227_v20, 0.0 }
 0x3c4   : > { %v3837_v42 = vadd.f32 %v1236_v22, %v3480_v38 }
 0x3c5   : > { %v3831_v24 = vadd.f32 %v1235_v10, %v3472_v37  ;;  %v3026_v29 = vpop.f32.mrb[14].mxu0 }
 0x3c6   : > { %v1213_v36 = vadd.f32 %v3026_v29, %v1077_v61  ;;  %v1207_v32 = vpop.f32.mrb[15].mxu0 }
 0x3c7   : > { %v1208_v57 = vadd.f32 %v1207_v32, %v1075_v53  ;;  %2838 = vmatmul.mubr.msk.f32.gmra.mrb[24].mxu0 %vm594_vm1, %v3831_v24 }
 0x3c8   : > { %1374 = vmatprep.mubr.f32.mxu0 %v3304_v23  ;;  %v1230_v54 = vadd.f32 %v2825_v62, %v1213_v36 }
 0x3c9   : > { %v1229_v18 = vadd.f32 %v2825_v62, %v1208_v57 }
 0x3ca   : > { %v1238_v37 = vmax.f32 %v1230_v54, 0.0  ;;  %v2844_v54 = vld [vmem:[%s4626_s5 + $0x40] sm:$0xff] }
 0x3cb   : > { %v1237_v21 = vmax.f32 %v1229_v18, 0.0  ;;  %2839 = vmatmul.mubr.msk.f32.gmra.mrb[26].mxu0 %vm594_vm1, %v3837_v42  ;;  %v2845_v18 = vld [vmem:[%s4626_s5 + $0x48] sm:$0xff] }
 0x3cc   : > { %1380 = vmatprep.mubr.f32.mxu0 %v3304_v23  ;;  %v3849_v38 = vadd.f32 %v1238_v37, %v3490_v40  ;;  %v3139_v37 = vpack.c.bf16 %v2845_v18, %v2844_v54 }
 0x3cd   : > { %v3843_v33 = vadd.f32 %v1237_v21, %v3482_v39  ;;  %v2846_v21 = vld [vmem:[%s4626_s5 + $0x50] sm:$0xff] }
 0x3ce   : > { %3140 = vmatprep.subr.bf16.mxu1 %v3139_v37 }
 0x3cf   : > { %2840 = vmatmul.mubr.msk.f32.gmra.mrb[28].mxu0 %vm594_vm1, %v3843_v33  ;;  %3142 = vmatpush3.bf16.msra.mxu1 %v3139_v37 }
 0x3d0   : > { %1386 = vmatprep.mubr.f32.mxu0 %v3304_v23 }
 0x3d3   : > { %2841 = vmatmul.mubr.msk.f32.gmra.mrb[30].mxu0 %vm594_vm1, %v3849_v38 }
 0x487   : > { %v3853_v34 = vpop.f32.mrb[16].mxu0 }
 0x488   : > { %1513 = vrot.lane.b32.xlu0 %v3853_v34, %s3305_s24  ;;  %v3857_v26 = vpop.f32.mrb[17].mxu0  ;;  %v1393_v58 = vrot.slane %v3853_v34, 4 }
 0x489   : > { %v1561_v40 = vrot.slane %v3857_v26, 6 }
 0x48b   : > { %v1352_v39 = vpop.f32.mrb[18].mxu0 }
 0x48c   : > { %v1394_v35 = vrot.slane %v1352_v39, 4  ;;  %1515 = vrot.lane.b32.xlu0 %v1352_v39, %s3305_s24  ;;  %v3861_v59 = vpop.f32.mrb[19].mxu0 }
 0x48d   : > { %v1562_v1 = vrot.slane %v3861_v59, 6 }
 0x48e   : > { %v3867_v14 = vsel %vm788_vm6, %v1393_v58, %v1394_v35 }
 0x48f   : > { %v3869_v45 = vpop.f32.mrb[20].mxu0  ;;  %v3873_v25 = vsel %vm885_vm3, %v1561_v40, %v1562_v1 }
 0x490   : > { %v1395_v41 = vrot.slane %v3869_v45, 4  ;;  %1603 = vrot.lane.b32.xlu0 %v3861_v59, %s4631_s26  ;;  %v3878_v48 = vpop.f32.mrb[21].mxu0 }
 0x491   : > { %v1563_v52 = vrot.slane %v3878_v48, 6 }
 0x492   : > { %v3883_v56 = vsel %vm788_vm6, %v1394_v35, %v1395_v41  ;;  %v2848_v35 = vld [vmem:[%s4626_s5 + $0x60] sm:$0xff] }
 0x493   : > { %v1364_v60 = vpop.f32.mrb[22].mxu0  ;;  %v3887_v62 = vsel %vm885_vm3, %v1562_v1, %v1563_v52 }
 0x494   : > { %v1396_v6 = vrot.slane %v1364_v60, 4  ;;  %1519 = vrot.lane.b32.xlu0 %v1364_v60, %s3305_s24  ;;  %v3890_v0 = vpop.f32.mrb[23].mxu0 }
 0x495   : > { %v1564_v2 = vrot.slane %v3890_v0, 6 }
 0x496   : > { %v3895_v43 = vsel %vm788_vm6, %v1395_v41, %v1396_v6 }
 0x497   : > { %v3899_v9 = vsel %vm885_vm3, %v1563_v52, %v1564_v2 }
 0x498   : > { %1607 = vrot.lane.b32.xlu0 %v3890_v0, %s4631_s26 }
 0x49a   : > { %v3903_v47 = vpop.f32.mrb[24].mxu0 }
 0x49b   : > { %v1397_v51 = vrot.slane %v3903_v47, 4  ;;  %v3906_v49 = vpop.f32.mrb[25].mxu0 }
 0x49c   : > { %v1565_v5 = vrot.slane %v3906_v49, 6 }
 0x49d   : > { %v3911_v8 = vsel %vm788_vm6, %v1396_v6, %v1397_v51 }
 0x49e   : > { %v1376_v11 = vpop.f32.mrb[26].mxu0  ;;  %v3915_v3 = vsel %vm885_vm3, %v1564_v2, %v1565_v5 }
 0x49f   : > { %v1398_v12 = vrot.slane %v1376_v11, 4  ;;  %1523 = vrot.lane.b32.xlu0 %v1376_v11, %s3305_s24  ;;  %v3918_v13 = vpop.f32.mrb[27].mxu0 }
 0x4a0   : > { %v1566_v55 = vrot.slane %v3918_v13, 6 }
 0x4a1   : > { %v3923_v63 = vsel %vm788_vm6, %v1397_v51, %v1398_v12  ;;  %v2850_v51 = vld [vmem:[%s4626_s5 + $0x70] sm:$0xff] }
 0x4a2   : > { %v1382_v7 = vpop.f32.mrb[28].mxu0  ;;  %v3927_v15 = vsel %vm885_vm3, %v1565_v5, %v1566_v55  ;;  %v2851_v5 = vld [vmem:[%s4626_s5 + $0x78] sm:$0xff] }
 0x4a3   : > { %v1399_v30 = vrot.slane %v1382_v7, 4  ;;  %1611 = vrot.lane.b32.xlu0 %v3918_v13, %s4631_s26  ;;  %v3931_v50 = vpop.f32.mrb[29].mxu0 }
 0x4a4   : > { %v1567_v17 = vrot.slane %v3931_v50, 6 }
 0x4a5   : > { %v3936_v19 = vsel %vm788_vm6, %v1398_v12, %v1399_v30 }
 0x4a6   : > { %v3938_v31 = vpop.f32.mrb[30].mxu0  ;;  %v3942_v20 = vsel %vm885_vm3, %v1566_v55, %v1567_v17 }
 0x4a7   : > { %v1400_v10 = vrot.slane %v3938_v31, 4  ;;  %1613 = vrot.lane.b32.xlu0 %v3931_v50, %s4631_s26  ;;  %1527 = vrot.lane.b32.xlu1 %v3938_v31, %s3305_s24  ;;  %v3949_v61 = vpop.f32.mrb[31].mxu0 }
 0x4a8   : > { %v1568_v22 = vrot.slane %v3949_v61, 6 }
 0x4a9   : > { %v3954_v29 = vsel %vm788_vm6, %v1400_v10, %v1393_v58  ;;  %v3958_v53 = vsel %vm788_vm6, %v1399_v30, %v1400_v10 }
 0x4aa   : > { %v1576_v36 = vsel %vm885_vm3, %v1568_v22, %v1561_v40  ;;  %v3964_v32 = vsel %vm885_vm3, %v1567_v17, %v1568_v22  ;;  %v2849_v40 = vld [vmem:[%s4626_s5 + $0x68] sm:$0xff] }
 0x4ab   : > { %1425 = vrot.lane.b32.xlu0 %v3853_v34, %s4631_s26  ;;  %1601 = vrot.lane.b32.xlu1 %v3857_v26, %s4631_s26  ;;  %v3147_v52 = vpack.c.bf16 %v2849_v40, %v2848_v35  ;;  %v1577_v17 = vsel %vm894_vm4, %v1576_v36, 0.0 }
 0x4af   : > { %1427 = vrot.lane.b32.xlu0 %v1352_v39, %s4631_s26  ;;  %1517 = vrot.lane.b32.xlu1 %v3869_v45, %s3305_s24 }
 0x4b3   : > { %1483 = vrot.lane.b32.xlu0 %v1352_v39, %s3307_s25  ;;  %1605 = vrot.lane.b32.xlu1 %v3878_v48, %s4631_s26 }
 0x4b7   : > { %1429 = vrot.lane.b32.xlu0 %v3869_v45, %s4631_s26  ;;  %1521 = vrot.lane.b32.xlu1 %v3903_v47, %s3305_s24 }
 0x4bb   : > { %1431 = vrot.lane.b32.xlu0 %v1364_v60, %s4631_s26  ;;  %1609 = vrot.lane.b32.xlu1 %v3906_v49, %s4631_s26 }
 0x4bf   : > { %1487 = vrot.lane.b32.xlu0 %v1364_v60, %s3307_s25  ;;  %1525 = vrot.lane.b32.xlu1 %v1382_v7, %s3305_s24 }
 0x4c3   : > { %1433 = vrot.lane.b32.xlu0 %v3903_v47, %s4631_s26  ;;  %1615 = vrot.lane.b32.xlu1 %v3949_v61, %s4631_s26 }
 0x4c7   : > { %1435 = vrot.lane.b32.xlu0 %v1376_v11, %s4631_s26  ;;  %1439 = vrot.lane.b32.xlu1 %v3938_v31, %s4631_s26 }
 0x4cb   : > { %1491 = vrot.lane.b32.xlu0 %v1376_v11, %s3307_s25  ;;  %1481 = vrot.lane.b32.xlu1 %v3853_v34, %s3307_s25  ;;  %v2847_v34 = vld [vmem:[%s4626_s5 + $0x58] sm:$0xff]  ;;  %v3151_v11 = vpack.c.bf16 %v2851_v5, %v2850_v51 }
 0x4cc   : > { %v3143_v58 = vpack.c.bf16 %v2847_v34, %v2846_v21 }
 0x4ce   : > { %3144 = vmatprep.subr.bf16.mxu1 %v3143_v58 }
 0x4cf   : > { %1437 = vrot.lane.b32.xlu0 %v1382_v7, %s4631_s26  ;;  %1485 = vrot.lane.b32.xlu1 %v3869_v45, %s3307_s25  ;;  %s3240_s26 = scalar_lea.vmem %s4570_s23, 1024 }
 0x4d0   : > { %3146 = vmatpush3.bf16.msra.mxu1 %v3143_v58  ;;  %p3241_p11 = scmp.ne.s32.totalorder %s4570_s23, %s3240_s26 }
 0x4d1   : > { %3148 = vmatprep.subr.bf16.mxu1 %v3147_v52 }
 0x4d2   : > { %p3242_p12 = pnand %p3241_p11, %p3399_p5 }
 0x4d3   : > { %1493 = vrot.lane.b32.xlu0 %v1382_v7, %s3307_s25 }
 0x4d4   : > { %3150 = vmatpush3.bf16.msra.mxu1 %v3147_v52  ;;  %p3243_p13 = pneg %p3242_p12 }
 0x4d5   : > { %3152 = vmatprep.subr.bf16.mxu1 %v3151_v11 }
 0x4d8   : > { %3154 = vmatpush3.bf16.msra.mxu1 %v3151_v11 }
 0x4fa   : > { %v1514_v57 = vpop.permute.xlu0 %1513 }
 0x4fb   : > { %v1537_v1 = vrot.slane %v1514_v57, 4 }
 0x4fe   : > { %v1516_v39 = vpop.permute.xlu0 %1515 }
 0x4ff   : > { %v1538_v45 = vrot.slane %v1516_v39, 4 }
 0x501   : > { %v1551_v41 = vsel %vm788_vm6, %v1537_v1, %v1538_v45 }
 0x502   : > { %v1604_v60 = vpop.permute.xlu0 %1603  ;;  %v1586_v6 = vadd.f32 %v3873_v25, %v1551_v41 }
 0x504   : > { %v1626_v2 = vadd.f32 %v1604_v60, %v1586_v6 }
 0x506   : > { %1643 = vrot.lane.b32.xlu1 %v1626_v2, %s3305_s24  ;;  %v1520_v22 = vpop.permute.xlu0 %1519 }
 0x507   : > { %v1540_v18 = vrot.slane %v1520_v22, 4 }
 0x50a   : > { %v1608_v35 = vpop.permute.xlu0 %1607 }
 0x511   : > { %v1524_v41 = vpop.permute.xlu0 %1523 }
 0x515   : > { %v1612_v51 = vpop.permute.xlu0 %1611 }
 0x519   : > { %v1528_v12 = vpop.permute.xlu1 %1527 }
 0x51a   : > { %v1544_v55 = vrot.slane %v1528_v12, 4 }
 0x51c   : > { %v1552_v25 = vsel %vm788_vm6, %v1544_v55, %v1537_v1 }
 0x51d   : > { %v1553_v7 = vsel %vm797_vm7, %v1552_v25, 0.0  ;;  %v1602_v30 = vpop.permute.xlu1 %1601 }
 0x51e   : > { %v1585_v10 = vadd.f32 %v1577_v17, %v1553_v7 }
 0x520   : > { %v1625_v57 = vadd.f32 %v1602_v30, %v1585_v10 }
 0x521   : > { %v1518_v54 = vpop.permute.xlu1 %1517 }
 0x522   : > { %v1539_v21 = vrot.slane %v1518_v54, 4  ;;  %1641 = vrot.lane.b32.xlu1 %v1625_v57, %s3305_s24 }
 0x524   : > { %v1549_v37 = vsel %vm788_vm6, %v1539_v21, %v1540_v18  ;;  %v1550_v34 = vsel %vm788_vm6, %v1538_v45, %v1539_v21  ;;  %v1542_v45 = vrot.slane %v1524_v41, 4 }
 0x525   : > { %v1587_v39 = vadd.f32 %v3887_v62, %v1550_v34  ;;  %v1606_v58 = vpop.permute.xlu1 %1605  ;;  %v1588_v36 = vadd.f32 %v3899_v9, %v1549_v37 }
 0x527   : > { %v1627_v40 = vadd.f32 %v1606_v58, %v1587_v39  ;;  %v1628_v60 = vadd.f32 %v1608_v35, %v1588_v36 }
 0x529   : > { %v1522_v1 = vpop.permute.xlu1 %1521  ;;  %1645 = vrot.lane.b32.xlu1 %v1627_v40, %s3305_s24  ;;  %v1409_v40 = vsel %vm797_vm7, %v3954_v29, 0.0 }
 0x52a   : > { %v1541_v52 = vrot.slane %v1522_v1, 4 }
 0x52c   : > { %v1548_v6 = vsel %vm788_vm6, %v1540_v18, %v1541_v52  ;;  %v1547_v5 = vsel %vm788_vm6, %v1541_v52, %v1542_v45 }
 0x52d   : > { %v1610_v2 = vpop.permute.xlu1 %1609  ;;  %1647 = vrot.lane.b32.xlu1 %v1628_v60, %s3305_s24  ;;  %v1589_v62 = vadd.f32 %v3915_v3, %v1548_v6  ;;  %v1590_v25 = vadd.f32 %v3927_v15, %v1547_v5  ;;  %v1614_v3 = vpop.permute.xlu0 %1613  ;;  %v4102_v6 = vld [vmem:[%s4625_s4 + $0x1] ss:$0 sm:$0xff] }
 0x52f   : > { %v1629_v12 = vadd.f32 %v1610_v2, %v1589_v62  ;;  %v1630_v10 = vadd.f32 %v1612_v51, %v1590_v25 }
 0x531   : > { %v1526_v9 = vpop.permute.xlu1 %1525  ;;  %1489 = vrot.lane.b32.xlu1 %v3903_v47, %s3307_s25 }
 0x532   : > { %v1543_v11 = vrot.slane %v1526_v9, 4 }
 0x534   : > { %v1546_v7 = vsel %vm788_vm6, %v1542_v45, %v1543_v11  ;;  %v1545_v22 = vsel %vm788_vm6, %v1543_v11, %v1544_v55  ;;  %v2863_v55 = vld [vmem:[%s4624_s3 + $0x88] sm:$0xff] }
 0x535   : > { %1649 = vrot.lane.b32.xlu1 %v1629_v12, %s3305_s24  ;;  %v1591_v30 = vadd.f32 %v3942_v20, %v1546_v7  ;;  %v1592_v47 = vadd.f32 %v3964_v32, %v1545_v22  ;;  %v1616_v15 = vpop.permute.xlu1 %1615  ;;  %v2865_v32 = vld [vmem:[%s4624_s3 + $0x98] sm:$0xff] }
 0x536   : > { %v3155_v57 = vpack.c.bf16 %v2865_v32, %v2863_v55 }
 0x537   : > { %v1631_v17 = vadd.f32 %v1614_v3, %v1591_v30  ;;  %v1632_v20 = vadd.f32 %v1616_v15, %v1592_v47 }
 0x538   : > { %3156 = vmatprep.subr.bf16.mxu1 %v3155_v57 }
 0x539   : > { %1653 = vrot.lane.b32.xlu0 %v1631_v17, %s3305_s24  ;;  %1651 = vrot.lane.b32.xlu1 %v1630_v10, %s3305_s24  ;;  %v4084_v18 = vpop.permute.xlu1 %1439 }
 0x53d   : > { %1706 = vrot.lane.b32.xlu0 %v3857_v26, %s3307_s25  ;;  %1495 = vrot.lane.b32.xlu1 %v3938_v31, %s3307_s25  ;;  %v1426_v26 = vpop.permute.xlu0 %1425  ;;  %v1482_v37 = vpop.permute.xlu1 %1481 }
 0x53e   : > { %v1449_v34 = vrot.slane %v1426_v26, 6 }
 0x541   : > { %1710 = vrot.lane.b32.xlu0 %v3878_v48, %s3307_s25  ;;  %1655 = vrot.lane.b32.xlu1 %v1632_v20, %s3305_s24  ;;  %v1428_v48 = vpop.permute.xlu0 %1427  ;;  %v1486_v39 = vpop.permute.xlu1 %1485 }
 0x542   : > { %v1450_v21 = vrot.slane %v1428_v48, 6 }
 0x545   : > { %1714 = vrot.lane.b32.xlu0 %v3906_v49, %s3307_s25  ;;  %1708 = vrot.lane.b32.xlu1 %v3861_v59, %s3307_s25  ;;  %v1484_v31 = vpop.permute.xlu0 %1483 }
 0x549   : > { %1718 = vrot.lane.b32.xlu0 %v3931_v50, %s3307_s25  ;;  %1712 = vrot.lane.b32.xlu1 %v3890_v0, %s3307_s25  ;;  %v1430_v49 = vpop.permute.xlu0 %1429  ;;  %v1456_v50 = vrot.slane %v4084_v18, 6  ;;  %v1463_v0 = vsel %vm885_vm3, %v1449_v34, %v1450_v21  ;;  %v2862_v18 = vld [vmem:[%s4624_s3 + $0x80] sm:$0xff] }
 0x54a   : > { %v1474_v58 = vadd.f32 %v1463_v0, %v3867_v14  ;;  %v1451_v60 = vrot.slane %v1430_v49, 6 }
 0x54c   : > { %v1506_v41 = vadd.f32 %v1484_v31, %v1474_v58  ;;  %v1462_v51 = vsel %vm885_vm3, %v1450_v21, %v1451_v60 }
 0x54d   : > { %1716 = vrot.lane.b32.xlu1 %v3918_v13, %s3307_s25  ;;  %v1432_v54 = vpop.permute.xlu0 %1431  ;;  %v1464_v13 = vsel %vm885_vm3, %v1456_v50, %v1449_v34  ;;  %v1475_v25 = vadd.f32 %v1462_v51, %v3883_v56 }
 0x54e   : > { %v1465_v35 = vsel %vm894_vm4, %v1464_v13, 0.0  ;;  %v1452_v14 = vrot.slane %v1432_v54, 6 }
 0x54f   : > { %v1473_v36 = vadd.f32 %v1465_v35, %v1409_v40  ;;  %v1507_v17 = vadd.f32 %v1486_v39, %v1475_v25  ;;  %v2867_v25 = vld [vmem:[%s4624_s3 + $0xa8] sm:$0xff] }
 0x550   : > { %v1461_v12 = vsel %vm885_vm3, %v1451_v60, %v1452_v14 }
 0x551   : > { %1720 = vrot.lane.b32.xlu1 %v3949_v61, %s3307_s25  ;;  %v1488_v59 = vpop.permute.xlu0 %1487  ;;  %v1505_v45 = vadd.f32 %v1482_v37, %v1473_v36  ;;  %v1476_v3 = vadd.f32 %v1461_v12, %v3895_v43 }
 0x553   : > { %v1508_v55 = vadd.f32 %v1488_v59, %v1476_v3  ;;  %v2868_v3 = vld [vmem:[%s4624_s3 + $0xb0] sm:$0xff] }
 0x555   : > { %v1434_v61 = vpop.permute.xlu0 %1433 }
 0x556   : > { %v1453_v15 = vrot.slane %v1434_v61, 6 }
 0x558   : > { %v1460_v31 = vsel %vm885_vm3, %v1452_v14, %v1453_v15 }
 0x559   : > { %v1436_v52 = vpop.permute.xlu0 %1435  ;;  %v1477_v37 = vadd.f32 %v1460_v31, %v3911_v8 }
 0x55a   : > { %v1454_v32 = vrot.slane %v1436_v52, 6 }
 0x55c   : > { %v1459_v49 = vsel %vm885_vm3, %v1453_v15, %v1454_v32 }
 0x55d   : > { %v1492_v9 = vpop.permute.xlu0 %1491  ;;  %v1478_v34 = vadd.f32 %v1459_v49, %v3923_v63 }
 0x55f   : > { %v1510_v40 = vadd.f32 %v1492_v9, %v1478_v34 }
 0x561   : > { %v1438_v22 = vpop.permute.xlu0 %1437 }
 0x562   : > { %v1455_v57 = vrot.slane %v1438_v22, 6 }
 0x564   : > { %v1458_v54 = vsel %vm885_vm3, %v1454_v32, %v1455_v57 }
 0x565   : > { %v1479_v0 = vadd.f32 %v1458_v54, %v3936_v19  ;;  %v1494_v61 = vpop.permute.xlu0 %1493 }
 0x567   : > { %v1511_v36 = vadd.f32 %v1494_v61, %v1479_v0 }
 0x578   : > { %v1644_v1 = vpop.permute.xlu1 %1643 }
 0x579   : > { %v1666_v2 = vsel %vm594_vm1, %v1506_v41, %v1644_v1 }
 0x57a   : > { %v1682_v29 = vadd.f32 %v4102_v6, %v1666_v2  ;;  %v1457_v2 = vsel %vm885_vm3, %v1455_v57, %v1456_v50 }
 0x57b   : > { %v1480_v51 = vadd.f32 %v1457_v2, %v3958_v53  ;;  %v2864_v53 = vld [vmem:[%s4624_s3 + $0x90] sm:$0xff] }
 0x57c   : > { %v1690_v30 = vmax.f32 %v1682_v29, 0.0  ;;  %v3157_v50 = vpack.c.bf16 %v2864_v53, %v2862_v18 }
 0x594   : > { %v1642_v62 = vpop.permute.xlu1 %1641 }
 0x595   : > { %v1665_v5 = vsel %vm594_vm1, %v1505_v45, %v1642_v62 }
 0x596   : > { %v1681_v11 = vadd.f32 %v4102_v6, %v1665_v5 }
 0x598   : > { %v1689_v7 = vmax.f32 %v1681_v11, 0.0 }
 0x59a   : > { %3043 = vmatprep.mubr.msk.f32.mxu1 %vm1086_vm8, %v1689_v7 }
 0x59b   : > { %3044 = vmatmul.mubr.msk.f32.vlgmr.msra.gmra.mrb[16].mxu1 %vm1086_vm8, %v1690_v30  ;;  %v1646_v10 = vpop.permute.xlu1 %1645  ;;  %v2866_v30 = vld [vmem:[%s4624_s3 + $0xa0] sm:$0xff] }
 0x59c   : > { %v1667_v47 = vsel %vm594_vm1, %v1507_v17, %v1646_v10  ;;  %3158 = vmatpush1.bf16.msra.mxu1 %v3157_v50  ;;  %v3161_v17 = vpack.c.bf16 %v2868_v3, %v2866_v30 }
 0x59d   : > { %v1683_v20 = vadd.f32 %v4102_v6, %v1667_v47 }
 0x59f   : > { %v1691_v56 = vmax.f32 %v1683_v20, 0.0  ;;  %v1648_v26 = vpop.permute.xlu1 %1647  ;;  %v2861_v20 = vld [vmem:[%s4627_s6 + $0x1] ss:$0 sm:$0xff] }
 0x5a0   : > { %v1668_v48 = vsel %vm594_vm1, %v1508_v55, %v1648_v26 }
 0x5a1   : > { %v1684_v43 = vadd.f32 %v4102_v6, %v1668_v48  ;;  %3046 = vmatprep.mubr.msk.f32.mxu1 %vm1086_vm8, %v1691_v56 }
 0x5a3   : > { %v1692_v59 = vmax.f32 %v1684_v43, 0.0  ;;  %v1490_v21 = vpop.permute.xlu1 %1489 }
 0x5a4   : > { %v1509_v13 = vadd.f32 %v1490_v21, %v1477_v37 }
 0x5a5   : > { %3047 = vmatmul.mubr.msk.f32.gmra.mrb[18].mxu1 %vm1086_vm8, %v1692_v59 }
 0x5a7   : > { %v1650_v39 = vpop.permute.xlu1 %1649 }
 0x5a8   : > { %v1669_v58 = vsel %vm594_vm1, %v1509_v13, %v1650_v39 }
 0x5a9   : > { %v1685_v35 = vadd.f32 %v4102_v6, %v1669_v58 }
 0x5ab   : > { %v1693_v1 = vmax.f32 %v1685_v35, 0.0  ;;  %v1654_v41 = vpop.permute.xlu0 %1653  ;;  %v1652_v52 = vpop.permute.xlu1 %1651 }
 0x5ac   : > { %v1671_v8 = vsel %vm594_vm1, %v1511_v36, %v1654_v41  ;;  %v1670_v60 = vsel %vm594_vm1, %v1510_v40, %v1652_v52 }
 0x5ad   : > { %v1687_v63 = vadd.f32 %v4102_v6, %v1671_v8  ;;  %v1686_v19 = vadd.f32 %v4102_v6, %v1670_v60  ;;  %3049 = vmatprep.mubr.msk.f32.mxu1 %vm1086_vm8, %v1693_v1 }
 0x5af   : > { %v1695_v14 = vmax.f32 %v1687_v63, 0.0  ;;  %v1694_v45 = vmax.f32 %v1686_v19, 0.0  ;;  %v1496_v62 = vpop.permute.xlu1 %1495  ;;  %v1707_v47 = vpop.permute.xlu0 %1706 }
 0x5b0   : > { %v1512_v29 = vadd.f32 %v1496_v62, %v1480_v51 }
 0x5b1   : > { %3050 = vmatmul.mubr.msk.f32.gmra.mrb[20].mxu1 %vm1086_vm8, %v1694_v45 }
 0x5b2   : > { %3052 = vmatprep.mubr.msk.f32.mxu1 %vm1086_vm8, %v1695_v14 }
 0x5b3   : > { %v1656_v5 = vpop.permute.xlu1 %1655  ;;  %v1711_v54 = vpop.permute.xlu0 %1710 }
 0x5b4   : > { %v1672_v9 = vsel %vm594_vm1, %v1512_v29, %v1656_v5 }
 0x5b5   : > { %v1688_v11 = vadd.f32 %v4102_v6, %v1672_v9  ;;  %v2869_v6 = vld [vmem:[%s4624_s3 + $0xb8] sm:$0xff] }
 0x5b6   : > { %v3159_v7 = vpack.c.bf16 %v2869_v6, %v2867_v25 }
 0x5b7   : > { %v1696_v12 = vmax.f32 %v1688_v11, 0.0  ;;  %v1709_v10 = vpop.permute.xlu1 %1708  ;;  %v1715_v40 = vpop.permute.xlu0 %1714 }
 0x5b8   : > { %3160 = vmatprep.subr.bf16.mxu1 %v3159_v7 }
 0x5b9   : > { %3053 = vmatmul.mubr.msk.f32.gmra.mrb[22].mxu1 %vm1086_vm8, %v1696_v12 }
 0x5ba   : > { %1988 = vmatprep.mubr.f32.mxu1 %v3304_v23  ;;  %3162 = vmatpush1.bf16.msra.mxu1 %v3161_v17 }
 0x5bb   : > { %v1713_v31 = vpop.permute.xlu1 %1712  ;;  %v1719_v2 = vpop.permute.xlu0 %1718 }
 0x66e   : > { %v3045_v22 = vpop.f32.mrb[16].mxu1 }
 0x66f   : > { %v1826_v15 = vadd.f32 %v3045_v22, %v1709_v10  ;;  %v1820_v55 = vpop.f32.mrb[17].mxu1 }
 0x670   : > { %v1821_v32 = vadd.f32 %v1820_v55, %v1707_v47 }
 0x671   : > { %v1868_v57 = vadd.f32 %v2861_v20, %v1826_v15 }
 0x672   : > { %v1867_v56 = vadd.f32 %v2861_v20, %v1821_v32 }
 0x673   : > { %v1876_v48 = vmax.f32 %v1868_v57, 0.0 }
 0x674   : > { %v1875_v26 = vmax.f32 %v1867_v56, 0.0 }
 0x675   : > { %v4177_v37 = vadd.f32 %v1876_v48, %v3813_v46  ;;  %v1717_v46 = vpop.permute.xlu1 %1716 }
 0x676   : > { %v4171_v43 = vadd.f32 %v1875_v26, %v3807_v4 }
 0x678   : > { %v3048_v49 = vpop.f32.mrb[18].mxu1  ;;  %2870 = vmatmul.mubr.msk.f32.vlgmr.msra.gmra.mrb[24].mxu1 %vm594_vm1, %v4171_v43 }
 0x679   : > { %v1836_v59 = vadd.f32 %v3048_v49, %v1713_v31  ;;  %v1830_v21 = vpop.f32.mrb[19].mxu1  ;;  %1994 = vmatprep.mubr.f32.mxu1 %v3304_v23  ;;  %v1721_v60 = vpop.permute.xlu1 %1720 }
 0x67a   : > { %v1831_v34 = vadd.f32 %v1830_v21, %v1711_v54 }
 0x67b   : > { %v1870_v0 = vadd.f32 %v2861_v20, %v1836_v59 }
 0x67c   : > { %v1869_v13 = vadd.f32 %v2861_v20, %v1831_v34  ;;  %2871 = vmatmul.mubr.msk.f32.gmra.mrb[26].mxu1 %vm594_vm1, %v4177_v37 }
 0x67d   : > { %2000 = vmatprep.mubr.f32.mxu1 %v3304_v23  ;;  %v1878_v61 = vmax.f32 %v1870_v0, 0.0 }
 0x67e   : > { %v1877_v4 = vmax.f32 %v1869_v13, 0.0 }
 0x67f   : > { %v4189_v58 = vadd.f32 %v1878_v61, %v3825_v16 }
 0x680   : > { %v4183_v39 = vadd.f32 %v1877_v4, %v3818_v27 }
 0x682   : > { %2872 = vmatmul.mubr.msk.f32.gmra.mrb[28].mxu1 %vm594_vm1, %v4183_v39 }
 0x683   : > { %2006 = vmatprep.mubr.f32.mxu1 %v3304_v23 }
 0x684   : > { %v3051_v35 = vpop.f32.mrb[20].mxu1 }
 0x685   : > { %v1846_v36 = vadd.f32 %v3051_v35, %v1717_v46  ;;  %v1840_v1 = vpop.f32.mrb[21].mxu1 }
 0x686   : > { %v1841_v41 = vadd.f32 %v1840_v1, %v1715_v40  ;;  %2873 = vmatmul.mubr.msk.f32.gmra.mrb[30].mxu1 %vm594_vm1, %v4189_v58 }
 0x687   : > { %2012 = vmatprep.mubr.f32.mxu1 %v3304_v23  ;;  %v1872_v27 = vadd.f32 %v2861_v20, %v1846_v36 }
 0x688   : > { %v1871_v52 = vadd.f32 %v2861_v20, %v1841_v41 }
 0x689   : > { %v1880_v63 = vmax.f32 %v1872_v27, 0.0 }
 0x68a   : > { %v1879_v8 = vmax.f32 %v1871_v52, 0.0 }
 0x68b   : > { %v4201_v51 = vadd.f32 %v1880_v63, %v3837_v42 }
 0x68c   : > { %v4195_v19 = vadd.f32 %v1879_v8, %v3831_v24  ;;  %v3054_v16 = vpop.f32.mrb[22].mxu1 }
 0x68d   : > { %v1856_v14 = vadd.f32 %v3054_v16, %v1721_v60  ;;  %v1850_v45 = vpop.f32.mrb[23].mxu1 }
 0x68e   : > { %v1851_v62 = vadd.f32 %v1850_v45, %v1719_v2  ;;  %2874 = vmatmul.mubr.msk.f32.gmra.mrb[32].mxu1 %vm594_vm1, %v4195_v19  ;;  %v2880_v45 = vld [vmem:[%s4626_s5 + $0x80] sm:$0xff] }
 0x68f   : > { %2018 = vmatprep.mubr.f32.mxu1 %v3304_v23  ;;  %v1874_v29 = vadd.f32 %v2861_v20, %v1856_v14 }
 0x690   : > { %v1873_v5 = vadd.f32 %v2861_v20, %v1851_v62  ;;  %v2881_v62 = vld [vmem:[%s4626_s5 + $0x88] sm:$0xff] }
 0x691   : > { %v1882_v24 = vmax.f32 %v1874_v29, 0.0  ;;  %v2882_v29 = vld [vmem:[%s4626_s5 + $0x90] sm:$0xff] }
 0x692   : > { %v1881_v9 = vmax.f32 %v1873_v5, 0.0  ;;  %2875 = vmatmul.mubr.msk.f32.gmra.mrb[34].mxu1 %vm594_vm1, %v4201_v51  ;;  %v3163_v5 = vpack.c.bf16 %v2881_v62, %v2880_v45 }
 0x693   : > { %2024 = vmatprep.mubr.f32.mxu1 %v3304_v23  ;;  %v4213_v42 = vadd.f32 %v1882_v24, %v3849_v38 }
 0x694   : > { %v4207_v11 = vadd.f32 %v1881_v9, %v3843_v33  ;;  %v2883_v9 = vld [vmem:[%s4626_s5 + $0x98] sm:$0xff]  ;;  %3164 = vmatprep.subr.bf16.mxu0 %v3163_v5  ;;  %3187 = vmatprep.subr.bf16.mxu1 %v3163_v5 }
 0x695   : > { %v3167_v24 = vpack.c.bf16 %v2883_v9, %v2882_v29  ;;  %3166 = vmatpush3.bf16.msra.mxu0 %v3163_v5  ;;  %3191 = vmatpush3.bf16.msra.mxu1 %v3163_v5 }
 0x696   : > { %2876 = vmatmul.mubr.msk.f32.gmra.mrb[36].mxu1 %vm594_vm1, %v4207_v11 }
 0x697   : > { %2030 = vmatprep.mubr.f32.mxu1 %v3304_v23  ;;  %3168 = vmatprep.subr.bf16.mxu0 %v3167_v24 }
 0x698   : > { %3188 = vmatprep.subr.bf16.mxu1 %v3167_v24 }
 0x699   : > { %3170 = vmatpush3.bf16.msra.mxu0 %v3167_v24  ;;  %3192 = vmatpush3.bf16.msra.mxu1 %v3167_v24 }
 0x69a   : > { %2877 = vmatmul.mubr.msk.f32.gmra.mrb[38].mxu1 %vm594_vm1, %v4213_v42 }
 0x74b   : > { %v4217_v12 = vpop.f32.mrb[24].mxu1 }
 0x74c   : > { %2157 = vrot.lane.b32.xlu0 %v4217_v12, %s3305_s24  ;;  %v4221_v18 = vpop.f32.mrb[25].mxu1  ;;  %v2037_v23 = vrot.slane %v4217_v12, 6 }
 0x74d   : > { %2229 = vrot.lane.b32.xlu1 %v4221_v18, %s4635_s17  ;;  %v2189_v50 = vrot.slane %v4221_v18, 4 }
 0x74f   : > { %v4225_v33 = vpop.f32.mrb[26].mxu1 }
 0x750   : > { %v2038_v38 = vrot.slane %v4225_v33, 6  ;;  %v4229_v53 = vpop.f32.mrb[27].mxu1 }
 0x751   : > { %v2190_v25 = vrot.slane %v4229_v53, 4  ;;  %2159 = vrot.lane.b32.xlu1 %v4225_v33, %s3305_s24  ;;  %2231 = vrot.lane.b32.xlu0 %v4229_v53, %s4635_s17 }
 0x752   : > { %v4239_v6 = vsel %vm885_vm3, %v2037_v23, %v2038_v38 }
 0x753   : > { %v4243_v7 = vsel %vm788_vm6, %v2189_v50, %v2190_v25 }
 0x755   : > { %v2002_v30 = vpop.f32.mrb[28].mxu1 }
 0x756   : > { %v2039_v3 = vrot.slane %v2002_v30, 6  ;;  %2161 = vrot.lane.b32.xlu0 %v2002_v30, %s3305_s24  ;;  %v4246_v17 = vpop.f32.mrb[29].mxu1 }
 0x757   : > { %v2191_v10 = vrot.slane %v4246_v17, 4  ;;  %2233 = vrot.lane.b32.xlu1 %v4246_v17, %s4635_s17 }
 0x758   : > { %v4253_v22 = vsel %vm885_vm3, %v2038_v38, %v2039_v3  ;;  %v2886_v38 = vld [vmem:[%s4626_s5 + $0xb0] sm:$0xff] }
 0x759   : > { %v2008_v47 = vpop.f32.mrb[30].mxu1  ;;  %v4257_v15 = vsel %vm788_vm6, %v2190_v25, %v2191_v10 }
 0x75a   : > { %v2040_v20 = vrot.slane %v2008_v47, 6  ;;  %v4259_v55 = vpop.f32.mrb[31].mxu1 }
 0x75b   : > { %v2192_v32 = vrot.slane %v4259_v55, 4  ;;  %2163 = vrot.lane.b32.xlu1 %v2008_v47, %s3305_s24  ;;  %2235 = vrot.lane.b32.xlu0 %v4259_v55, %s4635_s17 }
 0x75c   : > { %v4267_v57 = vsel %vm885_vm3, %v2039_v3, %v2040_v20 }
 0x75d   : > { %v4271_v56 = vsel %vm788_vm6, %v2191_v10, %v2192_v32 }
 0x761   : > { %v2014_v26 = vpop.f32.mrb[32].mxu1 }
 0x762   : > { %v2041_v48 = vrot.slane %v2014_v26, 6  ;;  %2165 = vrot.lane.b32.xlu0 %v2014_v26, %s3305_s24  ;;  %v4274_v31 = vpop.f32.mrb[33].mxu1 }
 0x763   : > { %v2193_v49 = vrot.slane %v4274_v31, 4  ;;  %2237 = vrot.lane.b32.xlu1 %v4274_v31, %s4635_s17 }
 0x764   : > { %v4281_v54 = vsel %vm885_vm3, %v2040_v20, %v2041_v48 }
 0x765   : > { %v2020_v59 = vpop.f32.mrb[34].mxu1  ;;  %v4285_v21 = vsel %vm788_vm6, %v2192_v32, %v2193_v49 }
 0x766   : > { %v2042_v34 = vrot.slane %v2020_v59, 6  ;;  %v4287_v0 = vpop.f32.mrb[35].mxu1 }
 0x767   : > { %v2194_v13 = vrot.slane %v4287_v0, 4  ;;  %2167 = vrot.lane.b32.xlu1 %v2020_v59, %s3305_s24  ;;  %2239 = vrot.lane.b32.xlu0 %v4287_v0, %s4635_s17 }
 0x768   : > { %v4295_v4 = vsel %vm885_vm3, %v2041_v48, %v2042_v34 }
 0x769   : > { %v2026_v61 = vpop.f32.mrb[36].mxu1  ;;  %v4299_v46 = vsel %vm788_vm6, %v2193_v49, %v2194_v13 }
 0x76a   : > { %v2043_v35 = vrot.slane %v2026_v61, 6  ;;  %v4301_v40 = vpop.f32.mrb[37].mxu1 }
 0x76b   : > { %v2195_v36 = vrot.slane %v4301_v40, 4  ;;  %2169 = vrot.lane.b32.xlu0 %v2026_v61, %s3305_s24  ;;  %2241 = vrot.lane.b32.xlu1 %v4301_v40, %s4635_s17 }
 0x76c   : > { %v4309_v1 = vsel %vm885_vm3, %v2042_v34, %v2043_v35 }
 0x76d   : > { %v2032_v41 = vpop.f32.mrb[38].mxu1  ;;  %v4313_v27 = vsel %vm788_vm6, %v2194_v13, %v2195_v36 }
 0x76e   : > { %v2044_v52 = vrot.slane %v2032_v41, 6  ;;  %v4315_v8 = vpop.f32.mrb[39].mxu1 }
 0x76f   : > { %v2196_v60 = vrot.slane %v4315_v8, 4  ;;  %2069 = vrot.lane.b32.xlu1 %v4217_v12, %s4635_s17  ;;  %2243 = vrot.lane.b32.xlu0 %v4315_v8, %s4635_s17 }
 0x770   : > { %v4324_v63 = vsel %vm885_vm3, %v2044_v52, %v2037_v23  ;;  %v4328_v16 = vsel %vm885_vm3, %v2043_v35, %v2044_v52 }
 0x771   : > { %v2204_v2 = vsel %vm788_vm6, %v2196_v60, %v2189_v50  ;;  %v4334_v14 = vsel %vm788_vm6, %v2195_v36, %v2196_v60  ;;  %v2887_v50 = vld [vmem:[%s4626_s5 + $0xb8] sm:$0xff] }
 0x772   : > { %v3175_v25 = vpack.c.bf16 %v2887_v50, %v2886_v38  ;;  %v2205_v3 = vsel %vm797_vm7, %v2204_v2, 0.0 }
 0x773   : > { %2071 = vrot.lane.b32.xlu1 %v4225_v33, %s4635_s17  ;;  %2083 = vrot.lane.b32.xlu0 %v2032_v41, %s4635_s17 }
 0x777   : > { %2075 = vrot.lane.b32.xlu1 %v2008_v47, %s4635_s17  ;;  %2073 = vrot.lane.b32.xlu0 %v2002_v30, %s4635_s17 }
 0x77b   : > { %2127 = vrot.lane.b32.xlu1 %v4225_v33, %s3307_s25  ;;  %2125 = vrot.lane.b32.xlu0 %v4217_v12, %s3307_s25  ;;  %v2884_v12 = vld [vmem:[%s4626_s5 + $0xa0] sm:$0xff]  ;;  %v2885_v33 = vld [vmem:[%s4626_s5 + $0xa8] sm:$0xff] }
 0x77c   : > { %v3171_v23 = vpack.c.bf16 %v2885_v33, %v2884_v12 }
 0x77e   : > { %3172 = vmatprep.subr.bf16.mxu0 %v3171_v23  ;;  %3189 = vmatprep.subr.bf16.mxu1 %v3171_v23 }
 0x77f   : > { %2077 = vrot.lane.b32.xlu1 %v2014_v26, %s4635_s17  ;;  %2129 = vrot.lane.b32.xlu0 %v2002_v30, %s3307_s25 }
 0x780   : > { %3174 = vmatpush3.bf16.msra.mxu0 %v3171_v23  ;;  %3193 = vmatpush3.bf16.msra.mxu1 %v3171_v23 }
 0x781   : > { %3176 = vmatprep.subr.bf16.mxu0 %v3175_v25  ;;  %3190 = vmatprep.subr.bf16.mxu1 %v3175_v25 }
 0x783   : > { %2079 = vrot.lane.b32.xlu1 %v2020_v59, %s4635_s17  ;;  %2135 = vrot.lane.b32.xlu0 %v2020_v59, %s3307_s25 }
 0x784   : > { %3178 = vmatpush3.bf16.msra.mxu0 %v3175_v25  ;;  %3194 = vmatpush3.bf16.msra.mxu1 %v3175_v25 }
 0x787   : > { %2131 = vrot.lane.b32.xlu1 %v2008_v47, %s3307_s25  ;;  %2139 = vrot.lane.b32.xlu0 %v2032_v41, %s3307_s25 }
 0x78b   : > { %2081 = vrot.lane.b32.xlu1 %v2026_v61, %s4635_s17 }
 0x78f   : > { %2133 = vrot.lane.b32.xlu1 %v2014_v26, %s3307_s25 }
 0x793   : > { %2137 = vrot.lane.b32.xlu1 %v2026_v61, %s3307_s25 }
 0x7be   : > { %v2158_v30 = vpop.permute.xlu0 %2157 }
 0x7bf   : > { %v2230_v10 = vpop.permute.xlu1 %2229  ;;  %v2214_v20 = vadd.f32 %v4243_v7, %v2158_v30 }
 0x7c0   : > { %v2253_v47 = vadd.f32 %v2230_v10, %v2205_v3  ;;  %v2053_v3 = vsel %vm894_vm4, %v4324_v63, 0.0 }
 0x7c2   : > { %2269 = vrot.lane.b32.xlu0 %v2253_v47, %s3305_s24 }
 0x7c3   : > { %v2232_v32 = vpop.permute.xlu0 %2231  ;;  %v2160_v48 = vpop.permute.xlu1 %2159 }
 0x7c4   : > { %v2254_v26 = vadd.f32 %v2232_v32, %v2214_v20  ;;  %v2215_v49 = vadd.f32 %v4257_v15, %v2160_v48 }
 0x7c6   : > { %2271 = vrot.lane.b32.xlu0 %v2254_v26, %s3305_s24  ;;  %v4428_v26 = vld [vmem:[%s4625_s4 + $0x2] ss:$0 sm:$0xff] }
 0x7c8   : > { %v2162_v59 = vpop.permute.xlu0 %2161 }
 0x7c9   : > { %v2234_v34 = vpop.permute.xlu1 %2233  ;;  %v2216_v61 = vadd.f32 %v4271_v56, %v2162_v59 }
 0x7ca   : > { %v2255_v13 = vadd.f32 %v2234_v34, %v2215_v49 }
 0x7cc   : > { %2273 = vrot.lane.b32.xlu0 %v2255_v13, %s3305_s24 }
 0x7cd   : > { %v2236_v35 = vpop.permute.xlu0 %2235  ;;  %v2164_v7 = vpop.permute.xlu1 %2163 }
 0x7ce   : > { %v2256_v36 = vadd.f32 %v2236_v35, %v2216_v61  ;;  %v2217_v41 = vadd.f32 %v4285_v21, %v2164_v7 }
 0x7d0   : > { %2275 = vrot.lane.b32.xlu0 %v2256_v36, %s3305_s24 }
 0x7d4   : > { %v2166_v52 = vpop.permute.xlu0 %2165 }
 0x7d5   : > { %v2238_v60 = vpop.permute.xlu1 %2237  ;;  %v2218_v45 = vadd.f32 %v4299_v46, %v2166_v52 }
 0x7d6   : > { %v2257_v2 = vadd.f32 %v2238_v60, %v2217_v41 }
 0x7d8   : > { %2277 = vrot.lane.b32.xlu1 %v2257_v2, %s3305_s24 }
 0x7d9   : > { %v2240_v15 = vpop.permute.xlu0 %2239  ;;  %v2168_v62 = vpop.permute.xlu1 %2167 }
 0x7da   : > { %v2258_v29 = vadd.f32 %v2240_v15, %v2218_v45  ;;  %v2219_v56 = vadd.f32 %v4313_v27, %v2168_v62 }
 0x7dc   : > { %2279 = vrot.lane.b32.xlu0 %v2258_v29, %s3305_s24 }
 0x7dd   : > { %v2170_v5 = vpop.permute.xlu0 %2169  ;;  %v2242_v9 = vpop.permute.xlu1 %2241 }
 0x7de   : > { %v2259_v24 = vadd.f32 %v2242_v9, %v2219_v56  ;;  %v2220_v12 = vadd.f32 %v4334_v14, %v2170_v5 }
 0x7e0   : > { %2281 = vrot.lane.b32.xlu1 %v2259_v24, %s3305_s24 }
 0x7e1   : > { %v2244_v21 = vpop.permute.xlu0 %2243 }
 0x7e2   : > { %v2260_v33 = vadd.f32 %v2244_v21, %v2220_v12 }
 0x7e4   : > { %2283 = vrot.lane.b32.xlu0 %v2260_v33, %s3305_s24  ;;  %2334 = vrot.lane.b32.xlu1 %v4221_v18, %s3307_s25  ;;  %v2070_v18 = vpop.permute.xlu1 %2069 }
 0x7e5   : > { %v2093_v50 = vrot.slane %v2070_v18, 7 }
 0x7e8   : > { %2336 = vrot.lane.b32.xlu0 %v4229_v53, %s3307_s25  ;;  %2338 = vrot.lane.b32.xlu1 %v4246_v17, %s3307_s25  ;;  %v4411_v53 = vpop.permute.xlu0 %2083  ;;  %v2072_v46 = vpop.permute.xlu1 %2071 }
 0x7e9   : > { %v2094_v25 = vrot.slane %v2072_v46, 7 }
 0x7eb   : > { %v2107_v20 = vsel %vm918_vm2, %v2093_v50, %v2094_v25 }
 0x7ec   : > { %2340 = vrot.lane.b32.xlu0 %v4259_v55, %s3307_s25  ;;  %2342 = vrot.lane.b32.xlu1 %v4274_v31, %s3307_s25  ;;  %v2074_v17 = vpop.permute.xlu0 %2073  ;;  %v2076_v27 = vpop.permute.xlu1 %2075  ;;  %v2100_v31 = vrot.slane %v4411_v53, 7  ;;  %v2118_v34 = vadd.f32 %v2107_v20, %v4239_v6 }
 0x7ed   : > { %v2095_v48 = vrot.slane %v2074_v17, 7  ;;  %v2096_v61 = vrot.slane %v2076_v27, 7 }
 0x7ef   : > { %v2106_v35 = vsel %vm918_vm2, %v2094_v25, %v2095_v48  ;;  %v2105_v2 = vsel %vm918_vm2, %v2095_v48, %v2096_v61 }
 0x7f0   : > { %2344 = vrot.lane.b32.xlu0 %v4287_v0, %s3307_s25  ;;  %2346 = vrot.lane.b32.xlu1 %v4301_v40, %s3307_s25  ;;  %v2126_v14 = vpop.permute.xlu0 %2125  ;;  %v2128_v55 = vpop.permute.xlu1 %2127  ;;  %v2108_v40 = vsel %vm918_vm2, %v2100_v31, %v2093_v50  ;;  %v2119_v6 = vadd.f32 %v2106_v35, %v4253_v22  ;;  %v2120_v29 = vadd.f32 %v2105_v2, %v4267_v57  ;;  %v2520_v35 = vld [vmem:[%s4628_s7 + $0x8] sm:$0xff] }
 0x7f1   : > { %v2150_v13 = vadd.f32 %v2128_v55, %v2118_v34 }
 0x7f4   : > { %2348 = vrot.lane.b32.xlu0 %v4315_v8, %s3307_s25  ;;  %v2130_v23 = vpop.permute.xlu0 %2129  ;;  %v2078_v38 = vpop.permute.xlu1 %2077  ;;  %v2109_v8 = vsel %vm927_vm5, %v2108_v40, 0.0  ;;  %s3308_s25 = smov [#allocation2]  }
 0x7f5   : > { %v2117_v47 = vadd.f32 %v2109_v8, %v2053_v3  ;;  %v2151_v15 = vadd.f32 %v2130_v23, %v2119_v6  ;;  %v2097_v5 = vrot.slane %v2078_v38, 7  ;;  %s3244_s29 = sshll.u32 %s3308_s25, 4  ;;  %s3245_s29 = int_to_ptr.vmem [resolvable:$false] %s3244_s29 }
 0x7f6   : > { %s3246_s14 = scalar_lea.vmem %s3245_s29, 2048  ;;  %p3247_p0 = scmp.lt.s32.totalorder %s4570_s23, %s3245_s29 }
 0x7f7   : > { %v2149_v32 = vadd.f32 %v2126_v14, %v2117_v47  ;;  %v2104_v53 = vsel %vm918_vm2, %v2096_v61, %v2097_v5  ;;  %v2519_v61 = vld [vmem:[%s4628_s7] sm:$0xff]  ;;  %p3248_p1 = scmp.lt.s32.totalorder %s3246_s14, %s3240_s26 }
 0x7f8   : > { %v2136_v0 = vpop.permute.xlu0 %2135  ;;  %v2080_v30 = vpop.permute.xlu1 %2079  ;;  %v2121_v14 = vadd.f32 %v2104_v53, %v4281_v54 }
 0x7f9   : > { %v2098_v21 = vrot.slane %v2080_v30, 7  ;;  %p3249_p2 = por %p3248_p1, %p3247_p0 }
 0x7fb   : > { %v2103_v57 = vsel %vm918_vm2, %v2097_v5, %v2098_v21  ;;  %p3250_p3 = pnand %p3249_p2, %p3243_p13 }
 0x7fc   : > { %v4421_v10 = vpop.permute.xlu0 %2139  ;;  %v2132_v49 = vpop.permute.xlu1 %2131  ;;  %v2122_v23 = vadd.f32 %v2103_v57, %v4295_v4 }
 0x7fd   : > { %v2152_v12 = vadd.f32 %v2132_v49, %v2120_v29 }
 0x7fe   : > { %v2154_v30 = vadd.f32 %v2136_v0, %v2122_v23 }
 0x800   : > { %v2082_v52 = vpop.permute.xlu1 %2081 }
 0x801   : > { %v2099_v55 = vrot.slane %v2082_v52, 7 }
 0x803   : > { %v2102_v25 = vsel %vm918_vm2, %v2098_v21, %v2099_v55  ;;  %v2101_v3 = vsel %vm918_vm2, %v2099_v55, %v2100_v31 }
 0x804   : > { %v2134_v9 = vpop.permute.xlu1 %2133  ;;  %v2123_v20 = vadd.f32 %v2102_v25, %v4309_v1  ;;  %v2124_v48 = vadd.f32 %v2101_v3, %v4328_v16 }
 0x805   : > { %v2153_v38 = vadd.f32 %v2134_v9, %v2121_v14 }
 0x806   : > { %v2156_v31 = vadd.f32 %v4421_v10, %v2124_v48  ;;  %v3179_v10 = vpack.c.bf16 %v2520_v35, %v2519_v61 }
 0x808   : > { %v2138_v17 = vpop.permute.xlu1 %2137  ;;  %3180 = vmatprep.subr.bf16.mxu0 %v3179_v10 }
 0x809   : > { %v2155_v49 = vadd.f32 %v2138_v17, %v2123_v20 }
 0x834   : > { %v2270_v59 = vpop.permute.xlu0 %2269 }
 0x835   : > { %v2293_v28 = vsel %vm594_vm1, %v2149_v32, %v2270_v59 }
 0x836   : > { %v2309_v63 = vadd.f32 %v4428_v26, %v2293_v28 }
 0x838   : > { %v2317_v36 = vmax.f32 %v2309_v63, 0.0  ;;  %v2272_v7 = vpop.permute.xlu0 %2271 }
 0x839   : > { %v2294_v41 = vsel %vm594_vm1, %v2150_v13, %v2272_v7 }
 0x83a   : > { %v2310_v60 = vadd.f32 %v4428_v26, %v2294_v41  ;;  %3071 = vmatprep.mubr.msk.f32.mxu0 %vm1086_vm8, %v2317_v36  ;;  %v2522_v36 = vld [vmem:[%s4628_s7 + $0x18] sm:$0xff] }
 0x83c   : > { %v2318_v45 = vmax.f32 %v2310_v60, 0.0  ;;  %v2897_v60 = vld [vmem:[%s4627_s6 + $0x2] ss:$0 sm:$0xff] }
 0x83e   : > { %v2274_v62 = vpop.permute.xlu0 %2273  ;;  %3072 = vmatmul.mubr.msk.f32.vlgmr.msra.gmra.mrb[32].mxu0 %vm1086_vm8, %v2318_v45 }
 0x83f   : > { %v2295_v56 = vsel %vm594_vm1, %v2151_v15, %v2274_v62  ;;  %3182 = vmatpush3.bf16.msra.mxu0 %v3179_v10 }
 0x840   : > { %v2311_v24 = vadd.f32 %v4428_v26, %v2295_v56 }
 0x842   : > { %v2319_v33 = vmax.f32 %v2311_v24, 0.0  ;;  %v2276_v22 = vpop.permute.xlu0 %2275 }
 0x843   : > { %v2296_v18 = vsel %vm594_vm1, %v2152_v12, %v2276_v22 }
 0x844   : > { %v2312_v46 = vadd.f32 %v4428_v26, %v2296_v18  ;;  %3074 = vmatprep.mubr.msk.f32.mxu0 %vm1086_vm8, %v2319_v33 }
 0x846   : > { %v2320_v27 = vmax.f32 %v2312_v46, 0.0 }
 0x848   : > { %3075 = vmatmul.mubr.msk.f32.gmra.mrb[34].mxu0 %vm1086_vm8, %v2320_v27 }
 0x84a   : > { %v2278_v50 = vpop.permute.xlu1 %2277 }
 0x84b   : > { %v2297_v40 = vsel %vm594_vm1, %v2153_v38, %v2278_v50 }
 0x84c   : > { %v2313_v8 = vadd.f32 %v4428_v26, %v2297_v40 }
 0x84e   : > { %v2321_v47 = vmax.f32 %v2313_v8, 0.0  ;;  %v2280_v54 = vpop.permute.xlu0 %2279 }
 0x84f   : > { %v2298_v32 = vsel %vm594_vm1, %v2154_v30, %v2280_v54 }
 0x850   : > { %v2314_v4 = vadd.f32 %v4428_v26, %v2298_v32  ;;  %3077 = vmatprep.mubr.msk.f32.mxu1 %vm1086_vm8, %v2321_v47 }
 0x852   : > { %v2322_v59 = vmax.f32 %v2314_v4, 0.0  ;;  %v2282_v34 = vpop.permute.xlu1 %2281 }
 0x853   : > { %v2299_v0 = vsel %vm594_vm1, %v2155_v49, %v2282_v34 }
 0x854   : > { %v2315_v44 = vadd.f32 %v4428_v26, %v2299_v0  ;;  %3078 = vmatmul.mubr.msk.f32.vlgmr.msra.gmra.mrb[40].mxu1 %vm1086_vm8, %v2322_v59 }
 0x856   : > { %v2323_v1 = vmax.f32 %v2315_v44, 0.0  ;;  %v2284_v28 = vpop.permute.xlu0 %2283  ;;  %v2335_v6 = vpop.permute.xlu1 %2334 }
 0x857   : > { %v2300_v63 = vsel %vm594_vm1, %v2156_v31, %v2284_v28 }
 0x858   : > { %v2316_v13 = vadd.f32 %v4428_v26, %v2300_v63  ;;  %3080 = vmatprep.mubr.msk.f32.mxu1 %vm1086_vm8, %v2323_v1  ;;  %v2521_v26 = vld [vmem:[%s4628_s7 + $0x10] sm:$0xff] }
 0x859   : > { %v3183_v7 = vpack.c.bf16 %v2522_v36, %v2521_v26 }
 0x85a   : > { %v2324_v16 = vmax.f32 %v2316_v13, 0.0  ;;  %v2337_v41 = vpop.permute.xlu0 %2336  ;;  %v2339_v33 = vpop.permute.xlu1 %2338 }
 0x85b   : > { %3184 = vmatprep.subr.bf16.mxu0 %v3183_v7 }
 0x85c   : > { %3081 = vmatmul.mubr.msk.f32.gmra.mrb[42].mxu1 %vm1086_vm8, %v2324_v16  ;;  %3186 = vmatpush3.bf16.msra.mxu0 %v3183_v7 }
 0x85e   : > { %v2341_v12 = vpop.permute.xlu0 %2340  ;;  %v2343_v23 = vpop.permute.xlu1 %2342 }
 0x862   : > { %v2345_v14 = vpop.permute.xlu0 %2344  ;;  %v2347_v54 = vpop.permute.xlu1 %2346 }
 0x866   : > { %v2349_v3 = vpop.permute.xlu0 %2348 }
 0x911   : > { %v3073_v52 = vpop.f32.mrb[32].mxu0 }
 0x912   : > { %v2454_v2 = vadd.f32 %v3073_v52, %v2337_v41  ;;  %v2448_v45 = vpop.f32.mrb[33].mxu0 }
 0x913   : > { %v2449_v15 = vadd.f32 %v2448_v45, %v2335_v6 }
 0x914   : > { %v2496_v62 = vadd.f32 %v2897_v60, %v2454_v2 }
 0x915   : > { %v2495_v29 = vadd.f32 %v2897_v60, %v2449_v15 }
 0x916   : > { %v2504_v56 = vmax.f32 %v2496_v62, 0.0 }
 0x917   : > { %v2503_v5 = vmax.f32 %v2495_v29, 0.0 }
 0x918   : > { %v4493_v24 = vadd.f32 %v2504_v56, %v4177_v37 }
 0x919   : > { %v4490_v9 = vadd.f32 %v2503_v5, %v4171_v43 }
 0x91b   : > { %v3076_v21 = vpop.f32.mrb[34].mxu0  ;;  %3091 = vmatprep.mubr.msk.f32.mxu0 %vm594_vm1, %v4490_v9 }
 0x91c   : > { %v2464_v22 = vadd.f32 %v3076_v21, %v2341_v12  ;;  %v2458_v18 = vpop.f32.mrb[35].mxu0  ;;  %3092 = vmatmul.mubr.msk.f32.vlgmr.msra.gmra.mrb[36].mxu0 %vm594_vm1, %v4493_v24 }
 0x91d   : > { %v2459_v53 = vadd.f32 %v2458_v18, %v2339_v33 }
 0x91e   : > { %v2498_v46 = vadd.f32 %v2897_v60, %v2464_v22 }
 0x91f   : > { %v2497_v57 = vadd.f32 %v2897_v60, %v2459_v53 }
 0x920   : > { %v2506_v17 = vmax.f32 %v2498_v46, 0.0 }
 0x921   : > { %v2505_v43 = vmax.f32 %v2497_v57, 0.0 }
 0x922   : > { %v4503_v37 = vadd.f32 %v2506_v17, %v4189_v58 }
 0x923   : > { %v4500_v27 = vadd.f32 %v2505_v43, %v4183_v39 }
 0x925   : > { %3094 = vmatprep.mubr.msk.f32.mxu0 %vm594_vm1, %v4500_v27 }
 0x926   : > { %3095 = vmatmul.mubr.msk.f32.gmra.mrb[38].mxu0 %vm594_vm1, %v4503_v37 }
 0x927   : > { %v3079_v55 = vpop.f32.mrb[40].mxu1 }
 0x928   : > { %v2474_v38 = vadd.f32 %v3079_v55, %v2345_v14  ;;  %v2468_v50 = vpop.f32.mrb[41].mxu1 }
 0x929   : > { %v2469_v40 = vadd.f32 %v2468_v50, %v2343_v23 }
 0x92a   : > { %v2500_v25 = vadd.f32 %v2897_v60, %v2474_v38 }
 0x92b   : > { %v2499_v8 = vadd.f32 %v2897_v60, %v2469_v40 }
 0x92c   : > { %v2508_v30 = vmax.f32 %v2500_v25, 0.0 }
 0x92d   : > { %v2507_v39 = vmax.f32 %v2499_v8, 0.0 }
 0x92e   : > { %v2516_v20 = vadd.f32 %v2508_v30, %v4201_v51  ;;  %v2898_v51 = vld [vmem:[%s4629_s8] ss:$0 sm:$0xff] }
 0x92f   : > { %v4510_v58 = vadd.f32 %v2507_v39, %v4195_v19  ;;  %v3082_v47 = vpop.f32.mrb[42].mxu1 }
 0x930   : > { %v2484_v32 = vadd.f32 %v3082_v47, %v2349_v3  ;;  %v2478_v4 = vpop.f32.mrb[43].mxu1 }
 0x931   : > { %v2479_v48 = vadd.f32 %v2478_v4, %v2347_v54  ;;  %3097 = vmatprep.mubr.msk.f32.mxu0 %vm594_vm1, %v4510_v58 }
 0x932   : > { %v2502_v49 = vadd.f32 %v2897_v60, %v2484_v32  ;;  %3098 = vmatmul.mubr.msk.f32.gmra.mrb[40].mxu0 %vm594_vm1, %v2516_v20 }
 0x933   : > { %v2501_v59 = vadd.f32 %v2897_v60, %v2479_v48 }
 0x934   : > { %v2510_v34 = vmax.f32 %v2502_v49, 0.0 }
 0x935   : > { %v2509_v0 = vmax.f32 %v2501_v59, 0.0 }
 0x936   : > { %v2518_v19 = vadd.f32 %v2510_v34, %v4213_v42 }
 0x937   : > { %v4517_v44 = vadd.f32 %v2509_v0, %v4207_v11 }
 0x939   : > { %3100 = vmatprep.mubr.msk.f32.mxu0 %vm594_vm1, %v4517_v44 }
 0x93a   : > { %3101 = vmatmul.mubr.msk.f32.gmra.mrb[42].mxu0 %vm594_vm1, %v2518_v19 }
 0x9ef   : > { %v3093_v31 = vpop.f32.mrb[36].mxu0 }
 0x9f0   : > { %v2626_v1 = vadd.f32 %v3093_v31, %v2898_v51  ;;  %v2620_v28 = vpop.f32.mrb[37].mxu0 }
 0x9f1   : > { %v2621_v63 = vadd.f32 %v2898_v51, %v2620_v28 }
 0x9f2   : > { %2669 = vrot.lane.b32.xlu0 %v2626_v1, %s3305_s24 }
 0x9f3   : > { %2667 = vrot.lane.b32.xlu1 %v2621_v63, %s3305_s24 }
 0x9f9   : > { %v3096_v11 = vpop.f32.mrb[38].mxu0 }
 0x9fa   : > { %v2636_v13 = vadd.f32 %v3096_v11, %v2898_v51  ;;  %v2630_v42 = vpop.f32.mrb[39].mxu0 }
 0x9fb   : > { %v2631_v16 = vadd.f32 %v2898_v51, %v2630_v42 }
 0x9fc   : > { %2673 = vrot.lane.b32.xlu0 %v2636_v13, %s3305_s24 }
 0x9fd   : > { %2671 = vrot.lane.b32.xlu1 %v2631_v16, %s3305_s24 }
 0xa05   : > { %v3099_v61 = vpop.f32.mrb[40].mxu0 }
 0xa06   : > { %v2646_v35 = vadd.f32 %v3099_v61, %v2898_v51  ;;  %v2640_v10 = vpop.f32.mrb[41].mxu0 }
 0xa07   : > { %v2641_v26 = vadd.f32 %v2898_v51, %v2640_v10 }
 0xa08   : > { %2677 = vrot.lane.b32.xlu0 %v2646_v35, %s3305_s24 }
 0xa09   : > { %2675 = vrot.lane.b32.xlu1 %v2641_v26, %s3305_s24 }
 0xa0d   : > { %v3102_v36 = vpop.f32.mrb[42].mxu0 }
 0xa0e   : > { %v2656_v7 = vadd.f32 %v3102_v36, %v2898_v51  ;;  %v2650_v41 = vpop.f32.mrb[43].mxu0 }
 0xa0f   : > { %v2651_v52 = vadd.f32 %v2898_v51, %v2650_v41 }
 0xa10   : > { %2681 = vrot.lane.b32.xlu0 %v2656_v7, %s3305_s24 }
 0xa11   : > { %2679 = vrot.lane.b32.xlu1 %v2651_v52, %s3305_s24  ;;  %s2912_s24 = sshll.u32 %s3382_s13, 10  ;;  %s4580_s13 = scalar_lea.sflag [#allocation3], %s324_s16 }
 0xa12   : > { %s4568_s28 = scalar_lea.hbm %s4630_s9, %s2912_s24 }
 0xa64   : > { %v2670_v60 = vpop.permute.xlu0 %2669 }
 0xa65   : > { %v2692_v6 = vsel %vm594_vm1, %v4493_v24, %v2670_v60  ;;  %v2668_v2 = vpop.permute.xlu1 %2667 }
 0xa66   : > { %v2701_v45 = vsel %vm2699_vm9, %v2692_v6, 0.0  ;;  %v2691_v15 = vsel %vm594_vm1, %v4490_v9, %v2668_v2 }
 0xa67   : > { %2709 = vst [vmem:[%s4542_s22 + $0x8] sm:$0xff] %v2701_v45  ;;  %v2700_v62 = vsel %vm2699_vm9, %v2691_v15, 0.0 }
 0xa68   : > { %2708 = vst [vmem:[%s4542_s22] sm:$0xff] %v2700_v62 }
 0xa6e   : > { %v2674_v29 = vpop.permute.xlu0 %2673 }
 0xa6f   : > { %v2694_v56 = vsel %vm594_vm1, %v4503_v37, %v2674_v29  ;;  %v2672_v5 = vpop.permute.xlu1 %2671 }
 0xa70   : > { %v2703_v9 = vsel %vm2699_vm9, %v2694_v56, 0.0  ;;  %v2693_v24 = vsel %vm594_vm1, %v4500_v27, %v2672_v5 }
 0xa71   : > { %2711 = vst [vmem:[%s4542_s22 + $0x18] sm:$0xff] %v2703_v9  ;;  %v2702_v12 = vsel %vm2699_vm9, %v2693_v24, 0.0 }
 0xa72   : > { %2710 = vst [vmem:[%s4542_s22 + $0x10] sm:$0xff] %v2702_v12 }
 0xa7a   : > { %v2678_v21 = vpop.permute.xlu0 %2677 }
 0xa7b   : > { %v2696_v33 = vsel %vm594_vm1, %v2516_v20, %v2678_v21  ;;  %v2676_v22 = vpop.permute.xlu1 %2675 }
 0xa7c   : > { %v2705_v18 = vsel %vm2699_vm9, %v2696_v33, 0.0  ;;  %v2695_v53 = vsel %vm594_vm1, %v4510_v58, %v2676_v22 }
 0xa7d   : > { %2713 = vst [vmem:[%s4542_s22 + $0x28] sm:$0xff] %v2705_v18  ;;  %v2704_v46 = vsel %vm2699_vm9, %v2695_v53, 0.0 }
 0xa7e   : > { %2712 = vst [vmem:[%s4542_s22 + $0x20] sm:$0xff] %v2704_v46 }
 0xa82   : > { %v2682_v57 = vpop.permute.xlu0 %2681 }
 0xa83   : > { %v2698_v17 = vsel %vm594_vm1, %v2518_v19, %v2682_v57  ;;  %v2680_v43 = vpop.permute.xlu1 %2679 }
 0xa84   : > { %v2707_v27 = vsel %vm2699_vm9, %v2698_v17, 0.0  ;;  %v2697_v37 = vsel %vm594_vm1, %v4517_v44, %v2680_v43 }
 0xa85   : > { %2715 = vst [vmem:[%s4542_s22 + $0x38] sm:$0xff] %v2707_v27  ;;  %v2706_v14 = vsel %vm2699_vm9, %v2697_v37, 0.0 }
 0xa86   : > { %2714 = vst [vmem:[%s4542_s22 + $0x30] sm:$0xff] %v2706_v14 }
 0xa87   : > { %3253 = shalt.err (!%p3250_p3)
}
 0xa88   : > { %s3254_s16 = scalar_lea.hbm %s4568_s28, 1024  ;;  %s3258_s24 = scalar_lea.hbm %s4630_s9, 2048 }
 0xa89   : > { %p3255_p4 = scmp.ne.s32.totalorder %s4568_s28, %s3254_s16  ;;  %p3259_p9 = scmp.lt.u32.totalorder %s4568_s28, %s4630_s9 }
 0xa8a   : > { %p3260_p10 = scmp.lt.u32.totalorder %s3258_s24, %s3254_s16  ;;  %p3262_p12 = scmp.lt.u32.totalorder %s3254_s16, %s4568_s28 }
 0xa8b   : > { %p3256_p7 = pnand %p3255_p4, %p3399_p5 }
 0xa8c   : > { %p3261_p11 = por %p3260_p10, %p3259_p9 }
 0xa8d   : > { %p3257_p8 = pneg %p3256_p7 }
 0xa8e   : > { %p3263_p13 = por %p3262_p12, %p3261_p11 }
 0xa90   : > { %p3264_p0 = pnand %p3263_p13, %p3257_p8 }
 0xa92   : > { %3267 = shalt.err (!%p3264_p0)
}
 0xa93   : > { %s3309_s26 = smov 128   ;;  %s3310_s25 = smov 8  }
 0xa94   : > { %3195 = dma.vmem_to_hbm [thread:$0]  (%p3399_p5), %s4570_s23, 1024, %s4568_s28, %s4580_s13, %s3309_s26, %s3309_s26, %s3310_s25  }
 0xa95 PF: > { %p3201_p1 = scmp.ge.s32.totalorder %s3302_s12, 2  ;;  %s2745_s29 = sand.u32 1, %s3290_s30  }
 0xa96   : > { %s2746_s14 = scalar_lea.sflag [#allocation3], %s2745_s29 }
 0xa97   : > { %p3198_p2 = pnand %p3201_p1, %p3403_p6 }
 0xa99   : > { %3285 = dma.done.wait (!%p3198_p2), %s2746_s14, 1024  }
 0xa9a   : > { %3287 = vsyncadd (!%p3198_p2), %s2746_s14, 4294966272  ;;  %p19_p3 = scmp.ge.s32.totalorder %s3386_s15, 4   ;;  %s4636_s30 = smov %s3294_s10 }
 0xa9b   : > { %s4637_s10 = smov %s3298_s11  ;;  %s4638_s11 = smov %s3397_s18 }
 0xa9c   : > { %s4639_s12 = smov %s3386_s15  ;;  %21 = sbr.rel (!%p19_p3) target bundleno = 3 (0x3), region = 99 }
 0xaa3   :  { %2751 = vsyncpa [#allocation3], 1 }
 0xaa4   :  { %2753 = vsyncpa [#allocation3 + $0x1], 1 }

</bundles_post_ra>
